<compile_context>
chip_gen: v7x
topology: tpu7x:2x2x1
jax: 0.10.0
libtpu: 0.0.40
codegen_flags: <defaults>
</compile_context>

<pallas_src>
import functools

import jax
import jax.numpy as jnp
from jax.experimental import pallas as pl
from jax.experimental.pallas import tpu as pltpu


# ----------------------------------------------------------------------------
# Fused BiLSTM + hidden2tag Pallas kernel
# ----------------------------------------------------------------------------
def _bilstm_tag_kernel(x_ref, wih_ref, bih_ref, whh_ref, h0_ref, c0_ref,
                       wtag_ref, btag_ref, feats_ref, out_ref,
                       *, seq_len, hid):
    """Inputs:
      x_ref    (L, 2D)   bf16  row t = [x_t | x_{L-1-t}]
      wih_ref  (2D, 8H)  bf16  block-structured input-hidden weights, fused gate cols
                               [i_f|i_b|f_f|f_b|o_f|o_b|g_f|g_b]
      bih_ref  (1, 8H)   f32   summed b_ih + b_hh, both directions, same column order
      whh_ref  (2H, 8H)  bf16  block-diagonal recurrent weights ([h_f|h_b] -> gates)
      h0_ref   (8, 2H)   bf16  initial [h_fwd | h_bwd], row-replicated to 8 sublanes
      c0_ref   (8, 2H)   f32   initial [c_fwd | c_bwd], row-replicated
      wtag_ref (2H, Tp)  bf16  hidden2tag weights (tag dim zero-padded to 128 lanes)
      btag_ref (1, Tp)   f32
    Output:
      feats_ref (L, Tp)  f32   emission scores (lane-dense slab)
    Scratch:
      out_ref   (L, 2H)  f32   per-position [h_fwd | h_bwd] LSTM outputs."""
    two_h = 2 * hid

    # (1) Hoisted input projection: one MXU matmul covers every timestep and BOTH
    #     directions (bf16 operands, f32 accumulation).  Row t of the result already
    #     holds fwd gate pre-activations @ t and bwd ones @ L-1-t.
    xg = jnp.dot(x_ref[...], wih_ref[...],
                 preferred_element_type=jnp.float32) + bih_ref[...]     # (L, 8H) f32

    # (2) Bidirectional recurrence.  State lives in registers: h as a bf16 value
    #     (it only ever feeds the MXU), c in f32.  All 8 sublane rows are identical.
    h16 = h0_ref[...]                                                   # (8, 2H) bf16
    c = c0_ref[...]                                                     # (8, 2H) f32

    # Fully unrolled serial time loop: all indices are Python ints -> static slices.
    for t in range(seq_len):
        tr = seq_len - 1 - t                       # backward-direction position
        # Single block-diagonal recurrent matmul for both directions: (8, 8H).
        r = jnp.dot(h16, whh_ref[...], preferred_element_type=jnp.float32)
        gates = xg[t:t + 1, :] + r                 # (1,8H) row broadcast over sublanes
        # ONE sigmoid (i/f/o, both dirs) + ONE tanh (g, both dirs) per step.
        sig = jax.nn.sigmoid(gates[:, :6 * hid])   # [i_f i_b | f_f f_b | o_f o_b]
        g = jnp.tanh(gates[:, 6 * hid:])           # [g_f | g_b]
        i_g = sig[:, 0:two_h]
        f_g = sig[:, two_h:2 * two_h]
        o_g = sig[:, 2 * two_h:3 * two_h]
        # Vectorized cell update for BOTH directions at once (f32, no concatenates).
        c = f_g * c + i_g * g                      # (8, 2H)  [c_f | c_b]
        h = o_g * jnp.tanh(c)                      # (8, 2H)  [h_f | h_b]
        h16 = h.astype(jnp.bfloat16)               # bf16 shadow for the next matmul
        # Direct lane-slice stores at the final output positions (static indices).
        out_ref[t:t + 1, 0:hid] = h[0:1, 0:hid]            # fwd output @ position t
        out_ref[tr:tr + 1, hid:two_h] = h[0:1, hid:two_h]  # bwd output @ position L-1-t

    # (3) Fused hidden2tag emission projection on the VMEM-resident (L, 2H) outputs.
    feats_ref[...] = (jnp.dot(out_ref[...].astype(jnp.bfloat16), wtag_ref[...],
                              preferred_element_type=jnp.float32)
                      + btag_ref[...])


def lstm_tag_features(params, sentence):
    """sentence: (L, D) -> emission features (L, Tpad) via one fused Pallas call."""
    seq_len, in_dim = sentence.shape
    hid = params["whh"].shape[0] // 2             # per-direction hidden size
    tag_pad = params["wtag"].shape[1]

    # Merged input slab: row t = [x_t | x_{L-1-t}] (bf16, halves HBM->VMEM bytes).
    x_merged = jnp.concatenate([sentence, sentence[::-1]], axis=1).astype(jnp.bfloat16)

    # Recurrent state: only this needs sublane padding (row-replicated to 8, free).
    h0 = jnp.broadcast_to(
        jnp.concatenate([params["h0"][0], params["h0"][1]])[None, :],
        (8, 2 * hid)).astype(jnp.bfloat16)
    c0 = jnp.broadcast_to(
        jnp.concatenate([params["c0"][0], params["c0"][1]])[None, :],
        (8, 2 * hid)).astype(jnp.float32)

    kernel = functools.partial(_bilstm_tag_kernel, seq_len=seq_len, hid=hid)
    feats = pl.pallas_call(
        kernel,
        out_shape=jax.ShapeDtypeStruct((seq_len, tag_pad), jnp.float32),
        in_specs=[pl.BlockSpec(memory_space=pltpu.MemorySpace.VMEM)] * 8,
        out_specs=pl.BlockSpec(memory_space=pltpu.MemorySpace.VMEM),
        scratch_shapes=[
            pltpu.VMEM((seq_len, 2 * hid), jnp.float32),   # [h_fwd | h_bwd] per position
        ],
        compiler_params=pltpu.CompilerParams(vmem_limit_bytes=32 * 1024 * 1024),
    )(x_merged, params["wih"], params["bih"], params["whh"], h0, c0,
      params["wtag"], params["btag"])
    return feats


# ----------------------------------------------------------------------------
# Viterbi decode (matches BiLSTM_CRF._viterbi_decode)
# ----------------------------------------------------------------------------
def viterbi_decode(feats, transitions, start_tag, stop_tag):
    # TODO(synk): Viterbi DP + data-dependent backtrace kept in plain JAX
    # (tag set is tiny; no useful Pallas mapping).
    num_tags = transitions.shape[0]
    init = jnp.full((num_tags,), -10000.0, jnp.float32).at[start_tag].set(0.0)

    def fwd_step(fv, feat):
        cand = fv[None, :] + transitions          # cand[j, k] = fv[k] + T[to=j, from=k]
        bp = jnp.argmax(cand, axis=1)             # best predecessor per tag
        return jnp.max(cand, axis=1) + feat, bp

    fv_final, backptrs = jax.lax.scan(fwd_step, init, feats)
    terminal = fv_final + transitions[stop_tag]
    best_last = jnp.argmax(terminal)
    path_score = terminal[best_last]

    def back(tag, bp_t):
        return bp_t[tag], tag

    _start, path_rev = jax.lax.scan(back, best_last, backptrs[::-1])
    # TODO(synk): PyTorch asserts the backtrace sentinel == START_TAG; skipped under jit.
    return path_score, path_rev[::-1].astype(jnp.int32)


def bilstm_crf_forward(params, sentence, *, num_tags, start_tag, stop_tag):
    """Forward pass of BiLSTM_CRF: returns (viterbi_score, tag_seq)."""
    feats = lstm_tag_features(params, sentence)[:, :num_tags]     # (L, T)
    return viterbi_decode(feats, params["transitions"], start_tag, stop_tag)


# ----------------------------------------------------------------------------
# Deterministic parameter initialization (shapes from the module __init__)
# ----------------------------------------------------------------------------
def init_params(key, input_dim, tagset_size, hidden_dim, tag_pad=128):
    num_tags = tagset_size + 2
    start_tag, stop_tag = tagset_size, tagset_size + 1
    hid = hidden_dim // 2                         # per-direction hidden size
    keys = iter(jax.random.split(key, 32))

    def rnd(shape, scale=0.1):
        return scale * jax.random.normal(next(keys), shape, dtype=jnp.float32)

    # Per-direction weights in PyTorch nn.LSTM gate order [i | f | g | o].
    wih_f, wih_b = rnd((input_dim, 4 * hid)), rnd((input_dim, 4 * hid))
    whh_f, whh_b = rnd((hid, 4 * hid)), rnd((hid, 4 * hid))
    b_f = rnd((4 * hid,)) + rnd((4 * hid,))       # b_ih + b_hh summed (fwd)
    b_b = rnd((4 * hid,)) + rnd((4 * hid,))       # b_ih + b_hh summed (bwd)

    # Fused gate-column layout (each block = hid lanes):
    #   [ i_f | i_b | f_f | f_b | o_f | o_b | g_f | g_b ]
    # so the kernel applies ONE sigmoid to the first 6H lanes, ONE tanh to the last 2H.
    gate_base = {0: 0, 1: 2, 3: 4, 2: 6}          # pytorch gate idx -> fused pair base

    def place(dst, src, row0, direction):
        # Scatter src's 4 pytorch-ordered gate column blocks into dst's fused columns.
        for gidx, base in gate_base.items():
            blk = base + direction
            dst = dst.at[row0:row0 + src.shape[0],
                         blk * hid:(blk + 1) * hid].set(src[:, gidx * hid:(gidx + 1) * hid])
        return dst

    # Input-to-hidden weights, block structured for the merged (L, 2D) input slab
    # (row t = [x_t | x_{L-1-t}]): rows [0:D] feed fwd columns, rows [D:2D] feed bwd.
    wih = jnp.zeros((2 * input_dim, 8 * hid), jnp.float32)
    wih = place(wih, wih_f, 0, 0)
    wih = place(wih, wih_b, input_dim, 1)

    # Block-diagonal recurrent weights: state [h_f | h_b] (2H) -> fused gates (8H).
    whh = jnp.zeros((2 * hid, 8 * hid), jnp.float32)
    whh = place(whh, whh_f, 0, 0)
    whh = place(whh, whh_b, hid, 1)

    bih = jnp.zeros((1, 8 * hid), jnp.float32)
    bih = place(bih, b_f[None, :], 0, 0)
    bih = place(bih, b_b[None, :], 0, 1)

    # hidden2tag, zero-padded to a lane-dense tag dimension.
    w_tag, b_tag = rnd((hidden_dim, num_tags)), rnd((num_tags,))
    tag_pad = max(tag_pad, num_tags)
    wtag = jnp.zeros((hidden_dim, tag_pad), jnp.float32).at[:, :num_tags].set(w_tag)
    btag = jnp.zeros((1, tag_pad), jnp.float32).at[0, :num_tags].set(b_tag)

    trans = jax.random.normal(next(keys), (num_tags, num_tags), dtype=jnp.float32)
    trans = trans.at[start_tag, :].set(-10000.0).at[:, stop_tag].set(-10000.0)

    # TODO(synk): PyTorch's init_hidden() draws torch.randn on every forward call
    # (non-deterministic); here (h0, c0) are deterministic parameters from the key.
    h0 = jax.random.normal(next(keys), (2, hid), dtype=jnp.float32)
    c0 = jax.random.normal(next(keys), (2, hid), dtype=jnp.float32)

    return {
        "wih": wih.astype(jnp.bfloat16),   # bf16 MXU operands, f32 accumulation
        "whh": whh.astype(jnp.bfloat16),
        "wtag": wtag.astype(jnp.bfloat16),
        "bih": bih, "btag": btag,
        "transitions": trans,
        "h0": h0, "c0": c0,
    }


# ----------------------------------------------------------------------------
# Demo
# ----------------------------------------------------------------------------
if __name__ == "__main__":
    L = 16            # sentence length (static -> time loop fully unrolled)
    INPUT_DIM = 32
    TAGSET = 5        # module adds START/STOP -> 7 tags total
    HIDDEN = 32       # hidden_dim (per-direction = 16, fused gates = 128 lanes)

    key = jax.random.PRNGKey(0)
    kp, kx = jax.random.split(key)
    params = init_params(kp, INPUT_DIM, TAGSET, HIDDEN)
    sentence = jax.random.normal(kx, (L, INPUT_DIM), dtype=jnp.float32)

    fwd = jax.jit(functools.partial(
        bilstm_crf_forward,
        num_tags=TAGSET + 2, start_tag=TAGSET, stop_tag=TAGSET + 1))

    score, tag_seq = fwd(params, sentence)
    jax.block_until_ready((score, tag_seq))

    assert score.shape == () and score.dtype == jnp.float32
    assert tag_seq.shape == (L,) and tag_seq.dtype == jnp.int32
    assert bool(jnp.isfinite(score))
    assert bool(jnp.all((tag_seq >= 0) & (tag_seq < TAGSET + 2)))
    print("KERNEL_OK")
</pallas_src>

<mosaic_0001>
module attributes {stable_mosaic.version = 11 : i64} {
  func.func @_bilstm_tag_kernel(%arg0: memref<16x64xbf16, #tpu.memory_space<vmem>>, %arg1: memref<64x128xbf16, #tpu.memory_space<vmem>>, %arg2: memref<1x128xf32, #tpu.memory_space<vmem>>, %arg3: memref<32x128xbf16, #tpu.memory_space<vmem>>, %arg4: memref<8x32xbf16, #tpu.memory_space<vmem>>, %arg5: memref<8x32xf32, #tpu.memory_space<vmem>>, %arg6: memref<32x128xbf16, #tpu.memory_space<vmem>>, %arg7: memref<1x128xf32, #tpu.memory_space<vmem>>, %arg8: memref<16x128xf32, #tpu.memory_space<vmem>>, %arg9: memref<16x32xf32, #tpu.memory_space<vmem>>) attributes {dimension_semantics = [], scalar_prefetch = 0 : i64, scratch_operands = 1 : i64, tpu.core_type = #tpu.core_type<tc>} {
    %c0 = arith.constant 0 : index
    %c0_0 = arith.constant 0 : index
    %0 = vector.load %arg0[%c0, %c0_0] : memref<16x64xbf16, #tpu.memory_space<vmem>>, vector<16x64xbf16>
    %c0_1 = arith.constant 0 : index
    %c0_2 = arith.constant 0 : index
    %1 = vector.load %arg1[%c0_1, %c0_2] : memref<64x128xbf16, #tpu.memory_space<vmem>>, vector<64x128xbf16>
    %cst = arith.constant dense<0.000000e+00> : vector<16x128xf32>
    %2 = tpu.matmul %0, %1, %cst {dimension_numbers = #tpu.dot_dimension_numbers<[1], [0], [0], [1], [0, 0, 1, 1], [], []>} : vector<16x64xbf16>, vector<64x128xbf16>, vector<16x128xf32> -> vector<16x128xf32>
    %c0_3 = arith.constant 0 : index
    %c0_4 = arith.constant 0 : index
    %3 = vector.load %arg2[%c0_3, %c0_4] : memref<1x128xf32, #tpu.memory_space<vmem>>, vector<1x128xf32>
    %4 = vector.broadcast %3 : vector<1x128xf32> to vector<16x128xf32>
    %5 = arith.addf %2, %4 : vector<16x128xf32>
    %c0_5 = arith.constant 0 : index
    %c0_6 = arith.constant 0 : index
    %6 = vector.load %arg4[%c0_5, %c0_6] : memref<8x32xbf16, #tpu.memory_space<vmem>>, vector<8x32xbf16>
    %c0_7 = arith.constant 0 : index
    %c0_8 = arith.constant 0 : index
    %7 = vector.load %arg5[%c0_7, %c0_8] : memref<8x32xf32, #tpu.memory_space<vmem>>, vector<8x32xf32>
    %c0_9 = arith.constant 0 : index
    %c0_10 = arith.constant 0 : index
    %8 = vector.load %arg3[%c0_9, %c0_10] : memref<32x128xbf16, #tpu.memory_space<vmem>>, vector<32x128xbf16>
    %cst_11 = arith.constant dense<0.000000e+00> : vector<8x128xf32>
    %9 = tpu.matmul %6, %8, %cst_11 {dimension_numbers = #tpu.dot_dimension_numbers<[1], [0], [0], [1], [0, 0, 1, 1], [], []>} : vector<8x32xbf16>, vector<32x128xbf16>, vector<8x128xf32> -> vector<8x128xf32>
    %10 = vector.extract_strided_slice %5 {offsets = [0, 0], sizes = [1, 128], strides = [1, 1]} : vector<16x128xf32> to vector<1x128xf32>
    %11 = vector.broadcast %10 : vector<1x128xf32> to vector<8x128xf32>
    %12 = arith.addf %11, %9 : vector<8x128xf32>
    %13 = vector.extract_strided_slice %12 {offsets = [0, 0], sizes = [8, 96], strides = [1, 1]} : vector<8x128xf32> to vector<8x96xf32>
    %14 = arith.negf %13 : vector<8x96xf32>
    %15 = math.exp %14 : vector<8x96xf32>
    %cst_12 = arith.constant 1.000000e+00 : f32
    %16 = vector.broadcast %cst_12 : f32 to vector<8x96xf32>
    %17 = arith.addf %16, %15 : vector<8x96xf32>
    %18 = arith.divf %16, %17 : vector<8x96xf32>
    %19 = vector.extract_strided_slice %12 {offsets = [0, 96], sizes = [8, 32], strides = [1, 1]} : vector<8x128xf32> to vector<8x32xf32>
    %20 = math.tanh %19 : vector<8x32xf32>
    %21 = vector.extract_strided_slice %18 {offsets = [0, 0], sizes = [8, 32], strides = [1, 1]} : vector<8x96xf32> to vector<8x32xf32>
    %22 = vector.extract_strided_slice %18 {offsets = [0, 32], sizes = [8, 32], strides = [1, 1]} : vector<8x96xf32> to vector<8x32xf32>
    %23 = vector.extract_strided_slice %18 {offsets = [0, 64], sizes = [8, 32], strides = [1, 1]} : vector<8x96xf32> to vector<8x32xf32>
    %24 = arith.mulf %22, %7 : vector<8x32xf32>
    %25 = arith.mulf %21, %20 : vector<8x32xf32>
    %26 = arith.addf %24, %25 : vector<8x32xf32>
    %27 = math.tanh %26 : vector<8x32xf32>
    %28 = arith.mulf %23, %27 : vector<8x32xf32>
    %29 = arith.truncf %28 : vector<8x32xf32> to vector<8x32xbf16>
    %30 = vector.extract_strided_slice %28 {offsets = [0, 0], sizes = [1, 16], strides = [1, 1]} : vector<8x32xf32> to vector<1x16xf32>
    %c0_13 = arith.constant 0 : index
    %c0_14 = arith.constant 0 : index
    %31 = vector.load %arg9[%c0_13, %c0_14] : memref<16x32xf32, #tpu.memory_space<vmem>>, vector<1x16xf32>
    tpu.vector_store %arg9[%c0_13, %c0_14], %30 {strides = array<i32>} : memref<16x32xf32, #tpu.memory_space<vmem>>, vector<1x16xf32>,
    %32 = vector.extract_strided_slice %28 {offsets = [0, 16], sizes = [1, 16], strides = [1, 1]} : vector<8x32xf32> to vector<1x16xf32>
    %c15 = arith.constant 15 : index
    %c16 = arith.constant 16 : index
    %33 = vector.load %arg9[%c15, %c16] : memref<16x32xf32, #tpu.memory_space<vmem>>, vector<1x16xf32>
    tpu.vector_store %arg9[%c15, %c16], %32 {strides = array<i32>} : memref<16x32xf32, #tpu.memory_space<vmem>>, vector<1x16xf32>,
    %c0_15 = arith.constant 0 : index
    %c0_16 = arith.constant 0 : index
    %34 = vector.load %arg3[%c0_15, %c0_16] : memref<32x128xbf16, #tpu.memory_space<vmem>>, vector<32x128xbf16>
    %cst_17 = arith.constant dense<0.000000e+00> : vector<8x128xf32>
    %35 = tpu.matmul %29, %34, %cst_17 {dimension_numbers = #tpu.dot_dimension_numbers<[1], [0], [0], [1], [0, 0, 1, 1], [], []>} : vector<8x32xbf16>, vector<32x128xbf16>, vector<8x128xf32> -> vector<8x128xf32>
    %36 = vector.extract_strided_slice %5 {offsets = [1, 0], sizes = [1, 128], strides = [1, 1]} : vector<16x128xf32> to vector<1x128xf32>
    %37 = vector.broadcast %36 : vector<1x128xf32> to vector<8x128xf32>
    %38 = arith.addf %37, %35 : vector<8x128xf32>
    %39 = vector.extract_strided_slice %38 {offsets = [0, 0], sizes = [8, 96], strides = [1, 1]} : vector<8x128xf32> to vector<8x96xf32>
    %40 = arith.negf %39 : vector<8x96xf32>
    %41 = math.exp %40 : vector<8x96xf32>
    %cst_18 = arith.constant 1.000000e+00 : f32
    %42 = vector.broadcast %cst_18 : f32 to vector<8x96xf32>
    %43 = arith.addf %42, %41 : vector<8x96xf32>
    %44 = arith.divf %42, %43 : vector<8x96xf32>
    %45 = vector.extract_strided_slice %38 {offsets = [0, 96], sizes = [8, 32], strides = [1, 1]} : vector<8x128xf32> to vector<8x32xf32>
    %46 = math.tanh %45 : vector<8x32xf32>
    %47 = vector.extract_strided_slice %44 {offsets = [0, 0], sizes = [8, 32], strides = [1, 1]} : vector<8x96xf32> to vector<8x32xf32>
    %48 = vector.extract_strided_slice %44 {offsets = [0, 32], sizes = [8, 32], strides = [1, 1]} : vector<8x96xf32> to vector<8x32xf32>
    %49 = vector.extract_strided_slice %44 {offsets = [0, 64], sizes = [8, 32], strides = [1, 1]} : vector<8x96xf32> to vector<8x32xf32>
    %50 = arith.mulf %48, %26 : vector<8x32xf32>
    %51 = arith.mulf %47, %46 : vector<8x32xf32>
    %52 = arith.addf %50, %51 : vector<8x32xf32>
    %53 = math.tanh %52 : vector<8x32xf32>
    %54 = arith.mulf %49, %53 : vector<8x32xf32>
    %55 = arith.truncf %54 : vector<8x32xf32> to vector<8x32xbf16>
    %56 = vector.extract_strided_slice %54 {offsets = [0, 0], sizes = [1, 16], strides = [1, 1]} : vector<8x32xf32> to vector<1x16xf32>
    %c1 = arith.constant 1 : index
    %c0_19 = arith.constant 0 : index
    %57 = vector.load %arg9[%c1, %c0_19] : memref<16x32xf32, #tpu.memory_space<vmem>>, vector<1x16xf32>
    tpu.vector_store %arg9[%c1, %c0_19], %56 {strides = array<i32>} : memref<16x32xf32, #tpu.memory_space<vmem>>, vector<1x16xf32>,
    %58 = vector.extract_strided_slice %54 {offsets = [0, 16], sizes = [1, 16], strides = [1, 1]} : vector<8x32xf32> to vector<1x16xf32>
    %c14 = arith.constant 14 : index
    %c16_20 = arith.constant 16 : index
    %59 = vector.load %arg9[%c14, %c16_20] : memref<16x32xf32, #tpu.memory_space<vmem>>, vector<1x16xf32>
    tpu.vector_store %arg9[%c14, %c16_20], %58 {strides = array<i32>} : memref<16x32xf32, #tpu.memory_space<vmem>>, vector<1x16xf32>,
    %c0_21 = arith.constant 0 : index
    %c0_22 = arith.constant 0 : index
    %60 = vector.load %arg3[%c0_21, %c0_22] : memref<32x128xbf16, #tpu.memory_space<vmem>>, vector<32x128xbf16>
    %cst_23 = arith.constant dense<0.000000e+00> : vector<8x128xf32>
    %61 = tpu.matmul %55, %60, %cst_23 {dimension_numbers = #tpu.dot_dimension_numbers<[1], [0], [0], [1], [0, 0, 1, 1], [], []>} : vector<8x32xbf16>, vector<32x128xbf16>, vector<8x128xf32> -> vector<8x128xf32>
    %62 = vector.extract_strided_slice %5 {offsets = [2, 0], sizes = [1, 128], strides = [1, 1]} : vector<16x128xf32> to vector<1x128xf32>
    %63 = vector.broadcast %62 : vector<1x128xf32> to vector<8x128xf32>
    %64 = arith.addf %63, %61 : vector<8x128xf32>
    %65 = vector.extract_strided_slice %64 {offsets = [0, 0], sizes = [8, 96], strides = [1, 1]} : vector<8x128xf32> to vector<8x96xf32>
    %66 = arith.negf %65 : vector<8x96xf32>
    %67 = math.exp %66 : vector<8x96xf32>
    %cst_24 = arith.constant 1.000000e+00 : f32
    %68 = vector.broadcast %cst_24 : f32 to vector<8x96xf32>
    %69 = arith.addf %68, %67 : vector<8x96xf32>
    %70 = arith.divf %68, %69 : vector<8x96xf32>
    %71 = vector.extract_strided_slice %64 {offsets = [0, 96], sizes = [8, 32], strides = [1, 1]} : vector<8x128xf32> to vector<8x32xf32>
    %72 = math.tanh %71 : vector<8x32xf32>
    %73 = vector.extract_strided_slice %70 {offsets = [0, 0], sizes = [8, 32], strides = [1, 1]} : vector<8x96xf32> to vector<8x32xf32>
    %74 = vector.extract_strided_slice %70 {offsets = [0, 32], sizes = [8, 32], strides = [1, 1]} : vector<8x96xf32> to vector<8x32xf32>
    %75 = vector.extract_strided_slice %70 {offsets = [0, 64], sizes = [8, 32], strides = [1, 1]} : vector<8x96xf32> to vector<8x32xf32>
    %76 = arith.mulf %74, %52 : vector<8x32xf32>
    %77 = arith.mulf %73, %72 : vector<8x32xf32>
    %78 = arith.addf %76, %77 : vector<8x32xf32>
    %79 = math.tanh %78 : vector<8x32xf32>
    %80 = arith.mulf %75, %79 : vector<8x32xf32>
    %81 = arith.truncf %80 : vector<8x32xf32> to vector<8x32xbf16>
    %82 = vector.extract_strided_slice %80 {offsets = [0, 0], sizes = [1, 16], strides = [1, 1]} : vector<8x32xf32> to vector<1x16xf32>
    %c2 = arith.constant 2 : index
    %c0_25 = arith.constant 0 : index
    %83 = vector.load %arg9[%c2, %c0_25] : memref<16x32xf32, #tpu.memory_space<vmem>>, vector<1x16xf32>
    tpu.vector_store %arg9[%c2, %c0_25], %82 {strides = array<i32>} : memref<16x32xf32, #tpu.memory_space<vmem>>, vector<1x16xf32>,
    %84 = vector.extract_strided_slice %80 {offsets = [0, 16], sizes = [1, 16], strides = [1, 1]} : vector<8x32xf32> to vector<1x16xf32>
    %c13 = arith.constant 13 : index
    %c16_26 = arith.constant 16 : index
    %85 = vector.load %arg9[%c13, %c16_26] : memref<16x32xf32, #tpu.memory_space<vmem>>, vector<1x16xf32>
    tpu.vector_store %arg9[%c13, %c16_26], %84 {strides = array<i32>} : memref<16x32xf32, #tpu.memory_space<vmem>>, vector<1x16xf32>,
    %c0_27 = arith.constant 0 : index
    %c0_28 = arith.constant 0 : index
    %86 = vector.load %arg3[%c0_27, %c0_28] : memref<32x128xbf16, #tpu.memory_space<vmem>>, vector<32x128xbf16>
    %cst_29 = arith.constant dense<0.000000e+00> : vector<8x128xf32>
    %87 = tpu.matmul %81, %86, %cst_29 {dimension_numbers = #tpu.dot_dimension_numbers<[1], [0], [0], [1], [0, 0, 1, 1], [], []>} : vector<8x32xbf16>, vector<32x128xbf16>, vector<8x128xf32> -> vector<8x128xf32>
    %88 = vector.extract_strided_slice %5 {offsets = [3, 0], sizes = [1, 128], strides = [1, 1]} : vector<16x128xf32> to vector<1x128xf32>
    %89 = vector.broadcast %88 : vector<1x128xf32> to vector<8x128xf32>
    %90 = arith.addf %89, %87 : vector<8x128xf32>
    %91 = vector.extract_strided_slice %90 {offsets = [0, 0], sizes = [8, 96], strides = [1, 1]} : vector<8x128xf32> to vector<8x96xf32>
    %92 = arith.negf %91 : vector<8x96xf32>
    %93 = math.exp %92 : vector<8x96xf32>
    %cst_30 = arith.constant 1.000000e+00 : f32
    %94 = vector.broadcast %cst_30 : f32 to vector<8x96xf32>
    %95 = arith.addf %94, %93 : vector<8x96xf32>
    %96 = arith.divf %94, %95 : vector<8x96xf32>
    %97 = vector.extract_strided_slice %90 {offsets = [0, 96], sizes = [8, 32], strides = [1, 1]} : vector<8x128xf32> to vector<8x32xf32>
    %98 = math.tanh %97 : vector<8x32xf32>
    %99 = vector.extract_strided_slice %96 {offsets = [0, 0], sizes = [8, 32], strides = [1, 1]} : vector<8x96xf32> to vector<8x32xf32>
    %100 = vector.extract_strided_slice %96 {offsets = [0, 32], sizes = [8, 32], strides = [1, 1]} : vector<8x96xf32> to vector<8x32xf32>
    %101 = vector.extract_strided_slice %96 {offsets = [0, 64], sizes = [8, 32], strides = [1, 1]} : vector<8x96xf32> to vector<8x32xf32>
    %102 = arith.mulf %100, %78 : vector<8x32xf32>
    %103 = arith.mulf %99, %98 : vector<8x32xf32>
    %104 = arith.addf %102, %103 : vector<8x32xf32>
    %105 = math.tanh %104 : vector<8x32xf32>
    %106 = arith.mulf %101, %105 : vector<8x32xf32>
    %107 = arith.truncf %106 : vector<8x32xf32> to vector<8x32xbf16>
    %108 = vector.extract_strided_slice %106 {offsets = [0, 0], sizes = [1, 16], strides = [1, 1]} : vector<8x32xf32> to vector<1x16xf32>
    %c3 = arith.constant 3 : index
    %c0_31 = arith.constant 0 : index
    %109 = vector.load %arg9[%c3, %c0_31] : memref<16x32xf32, #tpu.memory_space<vmem>>, vector<1x16xf32>
    tpu.vector_store %arg9[%c3, %c0_31], %108 {strides = array<i32>} : memref<16x32xf32, #tpu.memory_space<vmem>>, vector<1x16xf32>,
    %110 = vector.extract_strided_slice %106 {offsets = [0, 16], sizes = [1, 16], strides = [1, 1]} : vector<8x32xf32> to vector<1x16xf32>
    %c12 = arith.constant 12 : index
    %c16_32 = arith.constant 16 : index
    %111 = vector.load %arg9[%c12, %c16_32] : memref<16x32xf32, #tpu.memory_space<vmem>>, vector<1x16xf32>
    tpu.vector_store %arg9[%c12, %c16_32], %110 {strides = array<i32>} : memref<16x32xf32, #tpu.memory_space<vmem>>, vector<1x16xf32>,
    %c0_33 = arith.constant 0 : index
    %c0_34 = arith.constant 0 : index
    %112 = vector.load %arg3[%c0_33, %c0_34] : memref<32x128xbf16, #tpu.memory_space<vmem>>, vector<32x128xbf16>
    %cst_35 = arith.constant dense<0.000000e+00> : vector<8x128xf32>
    %113 = tpu.matmul %107, %112, %cst_35 {dimension_numbers = #tpu.dot_dimension_numbers<[1], [0], [0], [1], [0, 0, 1, 1], [], []>} : vector<8x32xbf16>, vector<32x128xbf16>, vector<8x128xf32> -> vector<8x128xf32>
    %114 = vector.extract_strided_slice %5 {offsets = [4, 0], sizes = [1, 128], strides = [1, 1]} : vector<16x128xf32> to vector<1x128xf32>
    %115 = vector.broadcast %114 : vector<1x128xf32> to vector<8x128xf32>
    %116 = arith.addf %115, %113 : vector<8x128xf32>
    %117 = vector.extract_strided_slice %116 {offsets = [0, 0], sizes = [8, 96], strides = [1, 1]} : vector<8x128xf32> to vector<8x96xf32>
    %118 = arith.negf %117 : vector<8x96xf32>
    %119 = math.exp %118 : vector<8x96xf32>
    %cst_36 = arith.constant 1.000000e+00 : f32
    %120 = vector.broadcast %cst_36 : f32 to vector<8x96xf32>
    %121 = arith.addf %120, %119 : vector<8x96xf32>
    %122 = arith.divf %120, %121 : vector<8x96xf32>
    %123 = vector.extract_strided_slice %116 {offsets = [0, 96], sizes = [8, 32], strides = [1, 1]} : vector<8x128xf32> to vector<8x32xf32>
    %124 = math.tanh %123 : vector<8x32xf32>
    %125 = vector.extract_strided_slice %122 {offsets = [0, 0], sizes = [8, 32], strides = [1, 1]} : vector<8x96xf32> to vector<8x32xf32>
    %126 = vector.extract_strided_slice %122 {offsets = [0, 32], sizes = [8, 32], strides = [1, 1]} : vector<8x96xf32> to vector<8x32xf32>
    %127 = vector.extract_strided_slice %122 {offsets = [0, 64], sizes = [8, 32], strides = [1, 1]} : vector<8x96xf32> to vector<8x32xf32>
    %128 = arith.mulf %126, %104 : vector<8x32xf32>
    %129 = arith.mulf %125, %124 : vector<8x32xf32>
    %130 = arith.addf %128, %129 : vector<8x32xf32>
    %131 = math.tanh %130 : vector<8x32xf32>
    %132 = arith.mulf %127, %131 : vector<8x32xf32>
    %133 = arith.truncf %132 : vector<8x32xf32> to vector<8x32xbf16>
    %134 = vector.extract_strided_slice %132 {offsets = [0, 0], sizes = [1, 16], strides = [1, 1]} : vector<8x32xf32> to vector<1x16xf32>
    %c4 = arith.constant 4 : index
    %c0_37 = arith.constant 0 : index
    %135 = vector.load %arg9[%c4, %c0_37] : memref<16x32xf32, #tpu.memory_space<vmem>>, vector<1x16xf32>
    tpu.vector_store %arg9[%c4, %c0_37], %134 {strides = array<i32>} : memref<16x32xf32, #tpu.memory_space<vmem>>, vector<1x16xf32>,
    %136 = vector.extract_strided_slice %132 {offsets = [0, 16], sizes = [1, 16], strides = [1, 1]} : vector<8x32xf32> to vector<1x16xf32>
    %c11 = arith.constant 11 : index
    %c16_38 = arith.constant 16 : index
    %137 = vector.load %arg9[%c11, %c16_38] : memref<16x32xf32, #tpu.memory_space<vmem>>, vector<1x16xf32>
    tpu.vector_store %arg9[%c11, %c16_38], %136 {strides = array<i32>} : memref<16x32xf32, #tpu.memory_space<vmem>>, vector<1x16xf32>,
    %c0_39 = arith.constant 0 : index
    %c0_40 = arith.constant 0 : index
    %138 = vector.load %arg3[%c0_39, %c0_40] : memref<32x128xbf16, #tpu.memory_space<vmem>>, vector<32x128xbf16>
    %cst_41 = arith.constant dense<0.000000e+00> : vector<8x128xf32>
    %139 = tpu.matmul %133, %138, %cst_41 {dimension_numbers = #tpu.dot_dimension_numbers<[1], [0], [0], [1], [0, 0, 1, 1], [], []>} : vector<8x32xbf16>, vector<32x128xbf16>, vector<8x128xf32> -> vector<8x128xf32>
    %140 = vector.extract_strided_slice %5 {offsets = [5, 0], sizes = [1, 128], strides = [1, 1]} : vector<16x128xf32> to vector<1x128xf32>
    %141 = vector.broadcast %140 : vector<1x128xf32> to vector<8x128xf32>
    %142 = arith.addf %141, %139 : vector<8x128xf32>
    %143 = vector.extract_strided_slice %142 {offsets = [0, 0], sizes = [8, 96], strides = [1, 1]} : vector<8x128xf32> to vector<8x96xf32>
    %144 = arith.negf %143 : vector<8x96xf32>
    %145 = math.exp %144 : vector<8x96xf32>
    %cst_42 = arith.constant 1.000000e+00 : f32
    %146 = vector.broadcast %cst_42 : f32 to vector<8x96xf32>
    %147 = arith.addf %146, %145 : vector<8x96xf32>
    %148 = arith.divf %146, %147 : vector<8x96xf32>
    %149 = vector.extract_strided_slice %142 {offsets = [0, 96], sizes = [8, 32], strides = [1, 1]} : vector<8x128xf32> to vector<8x32xf32>
    %150 = math.tanh %149 : vector<8x32xf32>
    %151 = vector.extract_strided_slice %148 {offsets = [0, 0], sizes = [8, 32], strides = [1, 1]} : vector<8x96xf32> to vector<8x32xf32>
    %152 = vector.extract_strided_slice %148 {offsets = [0, 32], sizes = [8, 32], strides = [1, 1]} : vector<8x96xf32> to vector<8x32xf32>
    %153 = vector.extract_strided_slice %148 {offsets = [0, 64], sizes = [8, 32], strides = [1, 1]} : vector<8x96xf32> to vector<8x32xf32>
    %154 = arith.mulf %152, %130 : vector<8x32xf32>
    %155 = arith.mulf %151, %150 : vector<8x32xf32>
    %156 = arith.addf %154, %155 : vector<8x32xf32>
    %157 = math.tanh %156 : vector<8x32xf32>
    %158 = arith.mulf %153, %157 : vector<8x32xf32>
    %159 = arith.truncf %158 : vector<8x32xf32> to vector<8x32xbf16>
    %160 = vector.extract_strided_slice %158 {offsets = [0, 0], sizes = [1, 16], strides = [1, 1]} : vector<8x32xf32> to vector<1x16xf32>
    %c5 = arith.constant 5 : index
    %c0_43 = arith.constant 0 : index
    %161 = vector.load %arg9[%c5, %c0_43] : memref<16x32xf32, #tpu.memory_space<vmem>>, vector<1x16xf32>
    tpu.vector_store %arg9[%c5, %c0_43], %160 {strides = array<i32>} : memref<16x32xf32, #tpu.memory_space<vmem>>, vector<1x16xf32>,
    %162 = vector.extract_strided_slice %158 {offsets = [0, 16], sizes = [1, 16], strides = [1, 1]} : vector<8x32xf32> to vector<1x16xf32>
    %c10 = arith.constant 10 : index
    %c16_44 = arith.constant 16 : index
    %163 = vector.load %arg9[%c10, %c16_44] : memref<16x32xf32, #tpu.memory_space<vmem>>, vector<1x16xf32>
    tpu.vector_store %arg9[%c10, %c16_44], %162 {strides = array<i32>} : memref<16x32xf32, #tpu.memory_space<vmem>>, vector<1x16xf32>,
    %c0_45 = arith.constant 0 : index
    %c0_46 = arith.constant 0 : index
    %164 = vector.load %arg3[%c0_45, %c0_46] : memref<32x128xbf16, #tpu.memory_space<vmem>>, vector<32x128xbf16>
    %cst_47 = arith.constant dense<0.000000e+00> : vector<8x128xf32>
    %165 = tpu.matmul %159, %164, %cst_47 {dimension_numbers = #tpu.dot_dimension_numbers<[1], [0], [0], [1], [0, 0, 1, 1], [], []>} : vector<8x32xbf16>, vector<32x128xbf16>, vector<8x128xf32> -> vector<8x128xf32>
    %166 = vector.extract_strided_slice %5 {offsets = [6, 0], sizes = [1, 128], strides = [1, 1]} : vector<16x128xf32> to vector<1x128xf32>
    %167 = vector.broadcast %166 : vector<1x128xf32> to vector<8x128xf32>
    %168 = arith.addf %167, %165 : vector<8x128xf32>
    %169 = vector.extract_strided_slice %168 {offsets = [0, 0], sizes = [8, 96], strides = [1, 1]} : vector<8x128xf32> to vector<8x96xf32>
    %170 = arith.negf %169 : vector<8x96xf32>
    %171 = math.exp %170 : vector<8x96xf32>
    %cst_48 = arith.constant 1.000000e+00 : f32
    %172 = vector.broadcast %cst_48 : f32 to vector<8x96xf32>
    %173 = arith.addf %172, %171 : vector<8x96xf32>
    %174 = arith.divf %172, %173 : vector<8x96xf32>
    %175 = vector.extract_strided_slice %168 {offsets = [0, 96], sizes = [8, 32], strides = [1, 1]} : vector<8x128xf32> to vector<8x32xf32>
    %176 = math.tanh %175 : vector<8x32xf32>
    %177 = vector.extract_strided_slice %174 {offsets = [0, 0], sizes = [8, 32], strides = [1, 1]} : vector<8x96xf32> to vector<8x32xf32>
    %178 = vector.extract_strided_slice %174 {offsets = [0, 32], sizes = [8, 32], strides = [1, 1]} : vector<8x96xf32> to vector<8x32xf32>
    %179 = vector.extract_strided_slice %174 {offsets = [0, 64], sizes = [8, 32], strides = [1, 1]} : vector<8x96xf32> to vector<8x32xf32>
    %180 = arith.mulf %178, %156 : vector<8x32xf32>
    %181 = arith.mulf %177, %176 : vector<8x32xf32>
    %182 = arith.addf %180, %181 : vector<8x32xf32>
    %183 = math.tanh %182 : vector<8x32xf32>
    %184 = arith.mulf %179, %183 : vector<8x32xf32>
    %185 = arith.truncf %184 : vector<8x32xf32> to vector<8x32xbf16>
    %186 = vector.extract_strided_slice %184 {offsets = [0, 0], sizes = [1, 16], strides = [1, 1]} : vector<8x32xf32> to vector<1x16xf32>
    %c6 = arith.constant 6 : index
    %c0_49 = arith.constant 0 : index
    %187 = vector.load %arg9[%c6, %c0_49] : memref<16x32xf32, #tpu.memory_space<vmem>>, vector<1x16xf32>
    tpu.vector_store %arg9[%c6, %c0_49], %186 {strides = array<i32>} : memref<16x32xf32, #tpu.memory_space<vmem>>, vector<1x16xf32>,
    %188 = vector.extract_strided_slice %184 {offsets = [0, 16], sizes = [1, 16], strides = [1, 1]} : vector<8x32xf32> to vector<1x16xf32>
    %c9 = arith.constant 9 : index
    %c16_50 = arith.constant 16 : index
    %189 = vector.load %arg9[%c9, %c16_50] : memref<16x32xf32, #tpu.memory_space<vmem>>, vector<1x16xf32>
    tpu.vector_store %arg9[%c9, %c16_50], %188 {strides = array<i32>} : memref<16x32xf32, #tpu.memory_space<vmem>>, vector<1x16xf32>,
    %c0_51 = arith.constant 0 : index
    %c0_52 = arith.constant 0 : index
    %190 = vector.load %arg3[%c0_51, %c0_52] : memref<32x128xbf16, #tpu.memory_space<vmem>>, vector<32x128xbf16>
    %cst_53 = arith.constant dense<0.000000e+00> : vector<8x128xf32>
    %191 = tpu.matmul %185, %190, %cst_53 {dimension_numbers = #tpu.dot_dimension_numbers<[1], [0], [0], [1], [0, 0, 1, 1], [], []>} : vector<8x32xbf16>, vector<32x128xbf16>, vector<8x128xf32> -> vector<8x128xf32>
    %192 = vector.extract_strided_slice %5 {offsets = [7, 0], sizes = [1, 128], strides = [1, 1]} : vector<16x128xf32> to vector<1x128xf32>
    %193 = vector.broadcast %192 : vector<1x128xf32> to vector<8x128xf32>
    %194 = arith.addf %193, %191 : vector<8x128xf32>
    %195 = vector.extract_strided_slice %194 {offsets = [0, 0], sizes = [8, 96], strides = [1, 1]} : vector<8x128xf32> to vector<8x96xf32>
    %196 = arith.negf %195 : vector<8x96xf32>
    %197 = math.exp %196 : vector<8x96xf32>
    %cst_54 = arith.constant 1.000000e+00 : f32
    %198 = vector.broadcast %cst_54 : f32 to vector<8x96xf32>
    %199 = arith.addf %198, %197 : vector<8x96xf32>
    %200 = arith.divf %198, %199 : vector<8x96xf32>
    %201 = vector.extract_strided_slice %194 {offsets = [0, 96], sizes = [8, 32], strides = [1, 1]} : vector<8x128xf32> to vector<8x32xf32>
    %202 = math.tanh %201 : vector<8x32xf32>
    %203 = vector.extract_strided_slice %200 {offsets = [0, 0], sizes = [8, 32], strides = [1, 1]} : vector<8x96xf32> to vector<8x32xf32>
    %204 = vector.extract_strided_slice %200 {offsets = [0, 32], sizes = [8, 32], strides = [1, 1]} : vector<8x96xf32> to vector<8x32xf32>
    %205 = vector.extract_strided_slice %200 {offsets = [0, 64], sizes = [8, 32], strides = [1, 1]} : vector<8x96xf32> to vector<8x32xf32>
    %206 = arith.mulf %204, %182 : vector<8x32xf32>
    %207 = arith.mulf %203, %202 : vector<8x32xf32>
    %208 = arith.addf %206, %207 : vector<8x32xf32>
    %209 = math.tanh %208 : vector<8x32xf32>
    %210 = arith.mulf %205, %209 : vector<8x32xf32>
    %211 = arith.truncf %210 : vector<8x32xf32> to vector<8x32xbf16>
    %212 = vector.extract_strided_slice %210 {offsets = [0, 0], sizes = [1, 16], strides = [1, 1]} : vector<8x32xf32> to vector<1x16xf32>
    %c7 = arith.constant 7 : index
    %c0_55 = arith.constant 0 : index
    %213 = vector.load %arg9[%c7, %c0_55] : memref<16x32xf32, #tpu.memory_space<vmem>>, vector<1x16xf32>
    tpu.vector_store %arg9[%c7, %c0_55], %212 {strides = array<i32>} : memref<16x32xf32, #tpu.memory_space<vmem>>, vector<1x16xf32>,
    %214 = vector.extract_strided_slice %210 {offsets = [0, 16], sizes = [1, 16], strides = [1, 1]} : vector<8x32xf32> to vector<1x16xf32>
    %c8 = arith.constant 8 : index
    %c16_56 = arith.constant 16 : index
    %215 = vector.load %arg9[%c8, %c16_56] : memref<16x32xf32, #tpu.memory_space<vmem>>, vector<1x16xf32>
    tpu.vector_store %arg9[%c8, %c16_56], %214 {strides = array<i32>} : memref<16x32xf32, #tpu.memory_space<vmem>>, vector<1x16xf32>,
    %c0_57 = arith.constant 0 : index
    %c0_58 = arith.constant 0 : index
    %216 = vector.load %arg3[%c0_57, %c0_58] : memref<32x128xbf16, #tpu.memory_space<vmem>>, vector<32x128xbf16>
    %cst_59 = arith.constant dense<0.000000e+00> : vector<8x128xf32>
    %217 = tpu.matmul %211, %216, %cst_59 {dimension_numbers = #tpu.dot_dimension_numbers<[1], [0], [0], [1], [0, 0, 1, 1], [], []>} : vector<8x32xbf16>, vector<32x128xbf16>, vector<8x128xf32> -> vector<8x128xf32>
    %218 = vector.extract_strided_slice %5 {offsets = [8, 0], sizes = [1, 128], strides = [1, 1]} : vector<16x128xf32> to vector<1x128xf32>
    %219 = vector.broadcast %218 : vector<1x128xf32> to vector<8x128xf32>
    %220 = arith.addf %219, %217 : vector<8x128xf32>
    %221 = vector.extract_strided_slice %220 {offsets = [0, 0], sizes = [8, 96], strides = [1, 1]} : vector<8x128xf32> to vector<8x96xf32>
    %222 = arith.negf %221 : vector<8x96xf32>
    %223 = math.exp %222 : vector<8x96xf32>
    %cst_60 = arith.constant 1.000000e+00 : f32
    %224 = vector.broadcast %cst_60 : f32 to vector<8x96xf32>
    %225 = arith.addf %224, %223 : vector<8x96xf32>
    %226 = arith.divf %224, %225 : vector<8x96xf32>
    %227 = vector.extract_strided_slice %220 {offsets = [0, 96], sizes = [8, 32], strides = [1, 1]} : vector<8x128xf32> to vector<8x32xf32>
    %228 = math.tanh %227 : vector<8x32xf32>
    %229 = vector.extract_strided_slice %226 {offsets = [0, 0], sizes = [8, 32], strides = [1, 1]} : vector<8x96xf32> to vector<8x32xf32>
    %230 = vector.extract_strided_slice %226 {offsets = [0, 32], sizes = [8, 32], strides = [1, 1]} : vector<8x96xf32> to vector<8x32xf32>
    %231 = vector.extract_strided_slice %226 {offsets = [0, 64], sizes = [8, 32], strides = [1, 1]} : vector<8x96xf32> to vector<8x32xf32>
    %232 = arith.mulf %230, %208 : vector<8x32xf32>
    %233 = arith.mulf %229, %228 : vector<8x32xf32>
    %234 = arith.addf %232, %233 : vector<8x32xf32>
    %235 = math.tanh %234 : vector<8x32xf32>
    %236 = arith.mulf %231, %235 : vector<8x32xf32>
    %237 = arith.truncf %236 : vector<8x32xf32> to vector<8x32xbf16>
    %238 = vector.extract_strided_slice %236 {offsets = [0, 0], sizes = [1, 16], strides = [1, 1]} : vector<8x32xf32> to vector<1x16xf32>
    %c8_61 = arith.constant 8 : index
    %c0_62 = arith.constant 0 : index
    %239 = vector.load %arg9[%c8_61, %c0_62] : memref<16x32xf32, #tpu.memory_space<vmem>>, vector<1x16xf32>
    tpu.vector_store %arg9[%c8_61, %c0_62], %238 {strides = array<i32>} : memref<16x32xf32, #tpu.memory_space<vmem>>, vector<1x16xf32>,
    %240 = vector.extract_strided_slice %236 {offsets = [0, 16], sizes = [1, 16], strides = [1, 1]} : vector<8x32xf32> to vector<1x16xf32>
    %c7_63 = arith.constant 7 : index
    %c16_64 = arith.constant 16 : index
    %241 = vector.load %arg9[%c7_63, %c16_64] : memref<16x32xf32, #tpu.memory_space<vmem>>, vector<1x16xf32>
    tpu.vector_store %arg9[%c7_63, %c16_64], %240 {strides = array<i32>} : memref<16x32xf32, #tpu.memory_space<vmem>>, vector<1x16xf32>,
    %c0_65 = arith.constant 0 : index
    %c0_66 = arith.constant 0 : index
    %242 = vector.load %arg3[%c0_65, %c0_66] : memref<32x128xbf16, #tpu.memory_space<vmem>>, vector<32x128xbf16>
    %cst_67 = arith.constant dense<0.000000e+00> : vector<8x128xf32>
    %243 = tpu.matmul %237, %242, %cst_67 {dimension_numbers = #tpu.dot_dimension_numbers<[1], [0], [0], [1], [0, 0, 1, 1], [], []>} : vector<8x32xbf16>, vector<32x128xbf16>, vector<8x128xf32> -> vector<8x128xf32>
    %244 = vector.extract_strided_slice %5 {offsets = [9, 0], sizes = [1, 128], strides = [1, 1]} : vector<16x128xf32> to vector<1x128xf32>
    %245 = vector.broadcast %244 : vector<1x128xf32> to vector<8x128xf32>
    %246 = arith.addf %245, %243 : vector<8x128xf32>
    %247 = vector.extract_strided_slice %246 {offsets = [0, 0], sizes = [8, 96], strides = [1, 1]} : vector<8x128xf32> to vector<8x96xf32>
    %248 = arith.negf %247 : vector<8x96xf32>
    %249 = math.exp %248 : vector<8x96xf32>
    %cst_68 = arith.constant 1.000000e+00 : f32
    %250 = vector.broadcast %cst_68 : f32 to vector<8x96xf32>
    %251 = arith.addf %250, %249 : vector<8x96xf32>
    %252 = arith.divf %250, %251 : vector<8x96xf32>
    %253 = vector.extract_strided_slice %246 {offsets = [0, 96], sizes = [8, 32], strides = [1, 1]} : vector<8x128xf32> to vector<8x32xf32>
    %254 = math.tanh %253 : vector<8x32xf32>
    %255 = vector.extract_strided_slice %252 {offsets = [0, 0], sizes = [8, 32], strides = [1, 1]} : vector<8x96xf32> to vector<8x32xf32>
    %256 = vector.extract_strided_slice %252 {offsets = [0, 32], sizes = [8, 32], strides = [1, 1]} : vector<8x96xf32> to vector<8x32xf32>
    %257 = vector.extract_strided_slice %252 {offsets = [0, 64], sizes = [8, 32], strides = [1, 1]} : vector<8x96xf32> to vector<8x32xf32>
    %258 = arith.mulf %256, %234 : vector<8x32xf32>
    %259 = arith.mulf %255, %254 : vector<8x32xf32>
    %260 = arith.addf %258, %259 : vector<8x32xf32>
    %261 = math.tanh %260 : vector<8x32xf32>
    %262 = arith.mulf %257, %261 : vector<8x32xf32>
    %263 = arith.truncf %262 : vector<8x32xf32> to vector<8x32xbf16>
    %264 = vector.extract_strided_slice %262 {offsets = [0, 0], sizes = [1, 16], strides = [1, 1]} : vector<8x32xf32> to vector<1x16xf32>
    %c9_69 = arith.constant 9 : index
    %c0_70 = arith.constant 0 : index
    %265 = vector.load %arg9[%c9_69, %c0_70] : memref<16x32xf32, #tpu.memory_space<vmem>>, vector<1x16xf32>
    tpu.vector_store %arg9[%c9_69, %c0_70], %264 {strides = array<i32>} : memref<16x32xf32, #tpu.memory_space<vmem>>, vector<1x16xf32>,
    %266 = vector.extract_strided_slice %262 {offsets = [0, 16], sizes = [1, 16], strides = [1, 1]} : vector<8x32xf32> to vector<1x16xf32>
    %c6_71 = arith.constant 6 : index
    %c16_72 = arith.constant 16 : index
    %267 = vector.load %arg9[%c6_71, %c16_72] : memref<16x32xf32, #tpu.memory_space<vmem>>, vector<1x16xf32>
    tpu.vector_store %arg9[%c6_71, %c16_72], %266 {strides = array<i32>} : memref<16x32xf32, #tpu.memory_space<vmem>>, vector<1x16xf32>,
    %c0_73 = arith.constant 0 : index
    %c0_74 = arith.constant 0 : index
    %268 = vector.load %arg3[%c0_73, %c0_74] : memref<32x128xbf16, #tpu.memory_space<vmem>>, vector<32x128xbf16>
    %cst_75 = arith.constant dense<0.000000e+00> : vector<8x128xf32>
    %269 = tpu.matmul %263, %268, %cst_75 {dimension_numbers = #tpu.dot_dimension_numbers<[1], [0], [0], [1], [0, 0, 1, 1], [], []>} : vector<8x32xbf16>, vector<32x128xbf16>, vector<8x128xf32> -> vector<8x128xf32>
    %270 = vector.extract_strided_slice %5 {offsets = [10, 0], sizes = [1, 128], strides = [1, 1]} : vector<16x128xf32> to vector<1x128xf32>
    %271 = vector.broadcast %270 : vector<1x128xf32> to vector<8x128xf32>
    %272 = arith.addf %271, %269 : vector<8x128xf32>
    %273 = vector.extract_strided_slice %272 {offsets = [0, 0], sizes = [8, 96], strides = [1, 1]} : vector<8x128xf32> to vector<8x96xf32>
    %274 = arith.negf %273 : vector<8x96xf32>
    %275 = math.exp %274 : vector<8x96xf32>
    %cst_76 = arith.constant 1.000000e+00 : f32
    %276 = vector.broadcast %cst_76 : f32 to vector<8x96xf32>
    %277 = arith.addf %276, %275 : vector<8x96xf32>
    %278 = arith.divf %276, %277 : vector<8x96xf32>
    %279 = vector.extract_strided_slice %272 {offsets = [0, 96], sizes = [8, 32], strides = [1, 1]} : vector<8x128xf32> to vector<8x32xf32>
    %280 = math.tanh %279 : vector<8x32xf32>
    %281 = vector.extract_strided_slice %278 {offsets = [0, 0], sizes = [8, 32], strides = [1, 1]} : vector<8x96xf32> to vector<8x32xf32>
    %282 = vector.extract_strided_slice %278 {offsets = [0, 32], sizes = [8, 32], strides = [1, 1]} : vector<8x96xf32> to vector<8x32xf32>
    %283 = vector.extract_strided_slice %278 {offsets = [0, 64], sizes = [8, 32], strides = [1, 1]} : vector<8x96xf32> to vector<8x32xf32>
    %284 = arith.mulf %282, %260 : vector<8x32xf32>
    %285 = arith.mulf %281, %280 : vector<8x32xf32>
    %286 = arith.addf %284, %285 : vector<8x32xf32>
    %287 = math.tanh %286 : vector<8x32xf32>
    %288 = arith.mulf %283, %287 : vector<8x32xf32>
    %289 = arith.truncf %288 : vector<8x32xf32> to vector<8x32xbf16>
    %290 = vector.extract_strided_slice %288 {offsets = [0, 0], sizes = [1, 16], strides = [1, 1]} : vector<8x32xf32> to vector<1x16xf32>
    %c10_77 = arith.constant 10 : index
    %c0_78 = arith.constant 0 : index
    %291 = vector.load %arg9[%c10_77, %c0_78] : memref<16x32xf32, #tpu.memory_space<vmem>>, vector<1x16xf32>
    tpu.vector_store %arg9[%c10_77, %c0_78], %290 {strides = array<i32>} : memref<16x32xf32, #tpu.memory_space<vmem>>, vector<1x16xf32>,
    %292 = vector.extract_strided_slice %288 {offsets = [0, 16], sizes = [1, 16], strides = [1, 1]} : vector<8x32xf32> to vector<1x16xf32>
    %c5_79 = arith.constant 5 : index
    %c16_80 = arith.constant 16 : index
    %293 = vector.load %arg9[%c5_79, %c16_80] : memref<16x32xf32, #tpu.memory_space<vmem>>, vector<1x16xf32>
    tpu.vector_store %arg9[%c5_79, %c16_80], %292 {strides = array<i32>} : memref<16x32xf32, #tpu.memory_space<vmem>>, vector<1x16xf32>,
    %c0_81 = arith.constant 0 : index
    %c0_82 = arith.constant 0 : index
    %294 = vector.load %arg3[%c0_81, %c0_82] : memref<32x128xbf16, #tpu.memory_space<vmem>>, vector<32x128xbf16>
    %cst_83 = arith.constant dense<0.000000e+00> : vector<8x128xf32>
    %295 = tpu.matmul %289, %294, %cst_83 {dimension_numbers = #tpu.dot_dimension_numbers<[1], [0], [0], [1], [0, 0, 1, 1], [], []>} : vector<8x32xbf16>, vector<32x128xbf16>, vector<8x128xf32> -> vector<8x128xf32>
    %296 = vector.extract_strided_slice %5 {offsets = [11, 0], sizes = [1, 128], strides = [1, 1]} : vector<16x128xf32> to vector<1x128xf32>
    %297 = vector.broadcast %296 : vector<1x128xf32> to vector<8x128xf32>
    %298 = arith.addf %297, %295 : vector<8x128xf32>
    %299 = vector.extract_strided_slice %298 {offsets = [0, 0], sizes = [8, 96], strides = [1, 1]} : vector<8x128xf32> to vector<8x96xf32>
    %300 = arith.negf %299 : vector<8x96xf32>
    %301 = math.exp %300 : vector<8x96xf32>
    %cst_84 = arith.constant 1.000000e+00 : f32
    %302 = vector.broadcast %cst_84 : f32 to vector<8x96xf32>
    %303 = arith.addf %302, %301 : vector<8x96xf32>
    %304 = arith.divf %302, %303 : vector<8x96xf32>
    %305 = vector.extract_strided_slice %298 {offsets = [0, 96], sizes = [8, 32], strides = [1, 1]} : vector<8x128xf32> to vector<8x32xf32>
    %306 = math.tanh %305 : vector<8x32xf32>
    %307 = vector.extract_strided_slice %304 {offsets = [0, 0], sizes = [8, 32], strides = [1, 1]} : vector<8x96xf32> to vector<8x32xf32>
    %308 = vector.extract_strided_slice %304 {offsets = [0, 32], sizes = [8, 32], strides = [1, 1]} : vector<8x96xf32> to vector<8x32xf32>
    %309 = vector.extract_strided_slice %304 {offsets = [0, 64], sizes = [8, 32], strides = [1, 1]} : vector<8x96xf32> to vector<8x32xf32>
    %310 = arith.mulf %308, %286 : vector<8x32xf32>
    %311 = arith.mulf %307, %306 : vector<8x32xf32>
    %312 = arith.addf %310, %311 : vector<8x32xf32>
    %313 = math.tanh %312 : vector<8x32xf32>
    %314 = arith.mulf %309, %313 : vector<8x32xf32>
    %315 = arith.truncf %314 : vector<8x32xf32> to vector<8x32xbf16>
    %316 = vector.extract_strided_slice %314 {offsets = [0, 0], sizes = [1, 16], strides = [1, 1]} : vector<8x32xf32> to vector<1x16xf32>
    %c11_85 = arith.constant 11 : index
    %c0_86 = arith.constant 0 : index
    %317 = vector.load %arg9[%c11_85, %c0_86] : memref<16x32xf32, #tpu.memory_space<vmem>>, vector<1x16xf32>
    tpu.vector_store %arg9[%c11_85, %c0_86], %316 {strides = array<i32>} : memref<16x32xf32, #tpu.memory_space<vmem>>, vector<1x16xf32>,
    %318 = vector.extract_strided_slice %314 {offsets = [0, 16], sizes = [1, 16], strides = [1, 1]} : vector<8x32xf32> to vector<1x16xf32>
    %c4_87 = arith.constant 4 : index
    %c16_88 = arith.constant 16 : index
    %319 = vector.load %arg9[%c4_87, %c16_88] : memref<16x32xf32, #tpu.memory_space<vmem>>, vector<1x16xf32>
    tpu.vector_store %arg9[%c4_87, %c16_88], %318 {strides = array<i32>} : memref<16x32xf32, #tpu.memory_space<vmem>>, vector<1x16xf32>,
    %c0_89 = arith.constant 0 : index
    %c0_90 = arith.constant 0 : index
    %320 = vector.load %arg3[%c0_89, %c0_90] : memref<32x128xbf16, #tpu.memory_space<vmem>>, vector<32x128xbf16>
    %cst_91 = arith.constant dense<0.000000e+00> : vector<8x128xf32>
    %321 = tpu.matmul %315, %320, %cst_91 {dimension_numbers = #tpu.dot_dimension_numbers<[1], [0], [0], [1], [0, 0, 1, 1], [], []>} : vector<8x32xbf16>, vector<32x128xbf16>, vector<8x128xf32> -> vector<8x128xf32>
    %322 = vector.extract_strided_slice %5 {offsets = [12, 0], sizes = [1, 128], strides = [1, 1]} : vector<16x128xf32> to vector<1x128xf32>
    %323 = vector.broadcast %322 : vector<1x128xf32> to vector<8x128xf32>
    %324 = arith.addf %323, %321 : vector<8x128xf32>
    %325 = vector.extract_strided_slice %324 {offsets = [0, 0], sizes = [8, 96], strides = [1, 1]} : vector<8x128xf32> to vector<8x96xf32>
    %326 = arith.negf %325 : vector<8x96xf32>
    %327 = math.exp %326 : vector<8x96xf32>
    %cst_92 = arith.constant 1.000000e+00 : f32
    %328 = vector.broadcast %cst_92 : f32 to vector<8x96xf32>
    %329 = arith.addf %328, %327 : vector<8x96xf32>
    %330 = arith.divf %328, %329 : vector<8x96xf32>
    %331 = vector.extract_strided_slice %324 {offsets = [0, 96], sizes = [8, 32], strides = [1, 1]} : vector<8x128xf32> to vector<8x32xf32>
    %332 = math.tanh %331 : vector<8x32xf32>
    %333 = vector.extract_strided_slice %330 {offsets = [0, 0], sizes = [8, 32], strides = [1, 1]} : vector<8x96xf32> to vector<8x32xf32>
    %334 = vector.extract_strided_slice %330 {offsets = [0, 32], sizes = [8, 32], strides = [1, 1]} : vector<8x96xf32> to vector<8x32xf32>
    %335 = vector.extract_strided_slice %330 {offsets = [0, 64], sizes = [8, 32], strides = [1, 1]} : vector<8x96xf32> to vector<8x32xf32>
    %336 = arith.mulf %334, %312 : vector<8x32xf32>
    %337 = arith.mulf %333, %332 : vector<8x32xf32>
    %338 = arith.addf %336, %337 : vector<8x32xf32>
    %339 = math.tanh %338 : vector<8x32xf32>
    %340 = arith.mulf %335, %339 : vector<8x32xf32>
    %341 = arith.truncf %340 : vector<8x32xf32> to vector<8x32xbf16>
    %342 = vector.extract_strided_slice %340 {offsets = [0, 0], sizes = [1, 16], strides = [1, 1]} : vector<8x32xf32> to vector<1x16xf32>
    %c12_93 = arith.constant 12 : index
    %c0_94 = arith.constant 0 : index
    %343 = vector.load %arg9[%c12_93, %c0_94] : memref<16x32xf32, #tpu.memory_space<vmem>>, vector<1x16xf32>
    tpu.vector_store %arg9[%c12_93, %c0_94], %342 {strides = array<i32>} : memref<16x32xf32, #tpu.memory_space<vmem>>, vector<1x16xf32>,
    %344 = vector.extract_strided_slice %340 {offsets = [0, 16], sizes = [1, 16], strides = [1, 1]} : vector<8x32xf32> to vector<1x16xf32>
    %c3_95 = arith.constant 3 : index
    %c16_96 = arith.constant 16 : index
    %345 = vector.load %arg9[%c3_95, %c16_96] : memref<16x32xf32, #tpu.memory_space<vmem>>, vector<1x16xf32>
    tpu.vector_store %arg9[%c3_95, %c16_96], %344 {strides = array<i32>} : memref<16x32xf32, #tpu.memory_space<vmem>>, vector<1x16xf32>,
    %c0_97 = arith.constant 0 : index
    %c0_98 = arith.constant 0 : index
    %346 = vector.load %arg3[%c0_97, %c0_98] : memref<32x128xbf16, #tpu.memory_space<vmem>>, vector<32x128xbf16>
    %cst_99 = arith.constant dense<0.000000e+00> : vector<8x128xf32>
    %347 = tpu.matmul %341, %346, %cst_99 {dimension_numbers = #tpu.dot_dimension_numbers<[1], [0], [0], [1], [0, 0, 1, 1], [], []>} : vector<8x32xbf16>, vector<32x128xbf16>, vector<8x128xf32> -> vector<8x128xf32>
    %348 = vector.extract_strided_slice %5 {offsets = [13, 0], sizes = [1, 128], strides = [1, 1]} : vector<16x128xf32> to vector<1x128xf32>
    %349 = vector.broadcast %348 : vector<1x128xf32> to vector<8x128xf32>
    %350 = arith.addf %349, %347 : vector<8x128xf32>
    %351 = vector.extract_strided_slice %350 {offsets = [0, 0], sizes = [8, 96], strides = [1, 1]} : vector<8x128xf32> to vector<8x96xf32>
    %352 = arith.negf %351 : vector<8x96xf32>
    %353 = math.exp %352 : vector<8x96xf32>
    %cst_100 = arith.constant 1.000000e+00 : f32
    %354 = vector.broadcast %cst_100 : f32 to vector<8x96xf32>
    %355 = arith.addf %354, %353 : vector<8x96xf32>
    %356 = arith.divf %354, %355 : vector<8x96xf32>
    %357 = vector.extract_strided_slice %350 {offsets = [0, 96], sizes = [8, 32], strides = [1, 1]} : vector<8x128xf32> to vector<8x32xf32>
    %358 = math.tanh %357 : vector<8x32xf32>
    %359 = vector.extract_strided_slice %356 {offsets = [0, 0], sizes = [8, 32], strides = [1, 1]} : vector<8x96xf32> to vector<8x32xf32>
    %360 = vector.extract_strided_slice %356 {offsets = [0, 32], sizes = [8, 32], strides = [1, 1]} : vector<8x96xf32> to vector<8x32xf32>
    %361 = vector.extract_strided_slice %356 {offsets = [0, 64], sizes = [8, 32], strides = [1, 1]} : vector<8x96xf32> to vector<8x32xf32>
    %362 = arith.mulf %360, %338 : vector<8x32xf32>
    %363 = arith.mulf %359, %358 : vector<8x32xf32>
    %364 = arith.addf %362, %363 : vector<8x32xf32>
    %365 = math.tanh %364 : vector<8x32xf32>
    %366 = arith.mulf %361, %365 : vector<8x32xf32>
    %367 = arith.truncf %366 : vector<8x32xf32> to vector<8x32xbf16>
    %368 = vector.extract_strided_slice %366 {offsets = [0, 0], sizes = [1, 16], strides = [1, 1]} : vector<8x32xf32> to vector<1x16xf32>
    %c13_101 = arith.constant 13 : index
    %c0_102 = arith.constant 0 : index
    %369 = vector.load %arg9[%c13_101, %c0_102] : memref<16x32xf32, #tpu.memory_space<vmem>>, vector<1x16xf32>
    tpu.vector_store %arg9[%c13_101, %c0_102], %368 {strides = array<i32>} : memref<16x32xf32, #tpu.memory_space<vmem>>, vector<1x16xf32>,
    %370 = vector.extract_strided_slice %366 {offsets = [0, 16], sizes = [1, 16], strides = [1, 1]} : vector<8x32xf32> to vector<1x16xf32>
    %c2_103 = arith.constant 2 : index
    %c16_104 = arith.constant 16 : index
    %371 = vector.load %arg9[%c2_103, %c16_104] : memref<16x32xf32, #tpu.memory_space<vmem>>, vector<1x16xf32>
    tpu.vector_store %arg9[%c2_103, %c16_104], %370 {strides = array<i32>} : memref<16x32xf32, #tpu.memory_space<vmem>>, vector<1x16xf32>,
    %c0_105 = arith.constant 0 : index
    %c0_106 = arith.constant 0 : index
    %372 = vector.load %arg3[%c0_105, %c0_106] : memref<32x128xbf16, #tpu.memory_space<vmem>>, vector<32x128xbf16>
    %cst_107 = arith.constant dense<0.000000e+00> : vector<8x128xf32>
    %373 = tpu.matmul %367, %372, %cst_107 {dimension_numbers = #tpu.dot_dimension_numbers<[1], [0], [0], [1], [0, 0, 1, 1], [], []>} : vector<8x32xbf16>, vector<32x128xbf16>, vector<8x128xf32> -> vector<8x128xf32>
    %374 = vector.extract_strided_slice %5 {offsets = [14, 0], sizes = [1, 128], strides = [1, 1]} : vector<16x128xf32> to vector<1x128xf32>
    %375 = vector.broadcast %374 : vector<1x128xf32> to vector<8x128xf32>
    %376 = arith.addf %375, %373 : vector<8x128xf32>
    %377 = vector.extract_strided_slice %376 {offsets = [0, 0], sizes = [8, 96], strides = [1, 1]} : vector<8x128xf32> to vector<8x96xf32>
    %378 = arith.negf %377 : vector<8x96xf32>
    %379 = math.exp %378 : vector<8x96xf32>
    %cst_108 = arith.constant 1.000000e+00 : f32
    %380 = vector.broadcast %cst_108 : f32 to vector<8x96xf32>
    %381 = arith.addf %380, %379 : vector<8x96xf32>
    %382 = arith.divf %380, %381 : vector<8x96xf32>
    %383 = vector.extract_strided_slice %376 {offsets = [0, 96], sizes = [8, 32], strides = [1, 1]} : vector<8x128xf32> to vector<8x32xf32>
    %384 = math.tanh %383 : vector<8x32xf32>
    %385 = vector.extract_strided_slice %382 {offsets = [0, 0], sizes = [8, 32], strides = [1, 1]} : vector<8x96xf32> to vector<8x32xf32>
    %386 = vector.extract_strided_slice %382 {offsets = [0, 32], sizes = [8, 32], strides = [1, 1]} : vector<8x96xf32> to vector<8x32xf32>
    %387 = vector.extract_strided_slice %382 {offsets = [0, 64], sizes = [8, 32], strides = [1, 1]} : vector<8x96xf32> to vector<8x32xf32>
    %388 = arith.mulf %386, %364 : vector<8x32xf32>
    %389 = arith.mulf %385, %384 : vector<8x32xf32>
    %390 = arith.addf %388, %389 : vector<8x32xf32>
    %391 = math.tanh %390 : vector<8x32xf32>
    %392 = arith.mulf %387, %391 : vector<8x32xf32>
    %393 = arith.truncf %392 : vector<8x32xf32> to vector<8x32xbf16>
    %394 = vector.extract_strided_slice %392 {offsets = [0, 0], sizes = [1, 16], strides = [1, 1]} : vector<8x32xf32> to vector<1x16xf32>
    %c14_109 = arith.constant 14 : index
    %c0_110 = arith.constant 0 : index
    %395 = vector.load %arg9[%c14_109, %c0_110] : memref<16x32xf32, #tpu.memory_space<vmem>>, vector<1x16xf32>
    tpu.vector_store %arg9[%c14_109, %c0_110], %394 {strides = array<i32>} : memref<16x32xf32, #tpu.memory_space<vmem>>, vector<1x16xf32>,
    %396 = vector.extract_strided_slice %392 {offsets = [0, 16], sizes = [1, 16], strides = [1, 1]} : vector<8x32xf32> to vector<1x16xf32>
    %c1_111 = arith.constant 1 : index
    %c16_112 = arith.constant 16 : index
    %397 = vector.load %arg9[%c1_111, %c16_112] : memref<16x32xf32, #tpu.memory_space<vmem>>, vector<1x16xf32>
    tpu.vector_store %arg9[%c1_111, %c16_112], %396 {strides = array<i32>} : memref<16x32xf32, #tpu.memory_space<vmem>>, vector<1x16xf32>,
    %c0_113 = arith.constant 0 : index
    %c0_114 = arith.constant 0 : index
    %398 = vector.load %arg3[%c0_113, %c0_114] : memref<32x128xbf16, #tpu.memory_space<vmem>>, vector<32x128xbf16>
    %cst_115 = arith.constant dense<0.000000e+00> : vector<8x128xf32>
    %399 = tpu.matmul %393, %398, %cst_115 {dimension_numbers = #tpu.dot_dimension_numbers<[1], [0], [0], [1], [0, 0, 1, 1], [], []>} : vector<8x32xbf16>, vector<32x128xbf16>, vector<8x128xf32> -> vector<8x128xf32>
    %400 = vector.extract_strided_slice %5 {offsets = [15, 0], sizes = [1, 128], strides = [1, 1]} : vector<16x128xf32> to vector<1x128xf32>
    %401 = vector.broadcast %400 : vector<1x128xf32> to vector<8x128xf32>
    %402 = arith.addf %401, %399 : vector<8x128xf32>
    %403 = vector.extract_strided_slice %402 {offsets = [0, 0], sizes = [8, 96], strides = [1, 1]} : vector<8x128xf32> to vector<8x96xf32>
    %404 = arith.negf %403 : vector<8x96xf32>
    %405 = math.exp %404 : vector<8x96xf32>
    %cst_116 = arith.constant 1.000000e+00 : f32
    %406 = vector.broadcast %cst_116 : f32 to vector<8x96xf32>
    %407 = arith.addf %406, %405 : vector<8x96xf32>
    %408 = arith.divf %406, %407 : vector<8x96xf32>
    %409 = vector.extract_strided_slice %402 {offsets = [0, 96], sizes = [8, 32], strides = [1, 1]} : vector<8x128xf32> to vector<8x32xf32>
    %410 = math.tanh %409 : vector<8x32xf32>
    %411 = vector.extract_strided_slice %408 {offsets = [0, 0], sizes = [8, 32], strides = [1, 1]} : vector<8x96xf32> to vector<8x32xf32>
    %412 = vector.extract_strided_slice %408 {offsets = [0, 32], sizes = [8, 32], strides = [1, 1]} : vector<8x96xf32> to vector<8x32xf32>
    %413 = vector.extract_strided_slice %408 {offsets = [0, 64], sizes = [8, 32], strides = [1, 1]} : vector<8x96xf32> to vector<8x32xf32>
    %414 = arith.mulf %412, %390 : vector<8x32xf32>
    %415 = arith.mulf %411, %410 : vector<8x32xf32>
    %416 = arith.addf %414, %415 : vector<8x32xf32>
    %417 = math.tanh %416 : vector<8x32xf32>
    %418 = arith.mulf %413, %417 : vector<8x32xf32>
    %419 = vector.extract_strided_slice %418 {offsets = [0, 0], sizes = [1, 16], strides = [1, 1]} : vector<8x32xf32> to vector<1x16xf32>
    %c15_117 = arith.constant 15 : index
    %c0_118 = arith.constant 0 : index
    %420 = vector.load %arg9[%c15_117, %c0_118] : memref<16x32xf32, #tpu.memory_space<vmem>>, vector<1x16xf32>
    tpu.vector_store %arg9[%c15_117, %c0_118], %419 {strides = array<i32>} : memref<16x32xf32, #tpu.memory_space<vmem>>, vector<1x16xf32>,
    %421 = vector.extract_strided_slice %418 {offsets = [0, 16], sizes = [1, 16], strides = [1, 1]} : vector<8x32xf32> to vector<1x16xf32>
    %c0_119 = arith.constant 0 : index
    %c16_120 = arith.constant 16 : index
    %422 = vector.load %arg9[%c0_119, %c16_120] : memref<16x32xf32, #tpu.memory_space<vmem>>, vector<1x16xf32>
    tpu.vector_store %arg9[%c0_119, %c16_120], %421 {strides = array<i32>} : memref<16x32xf32, #tpu.memory_space<vmem>>, vector<1x16xf32>,
    %c0_121 = arith.constant 0 : index
    %c0_122 = arith.constant 0 : index
    %423 = vector.load %arg9[%c0_121, %c0_122] : memref<16x32xf32, #tpu.memory_space<vmem>>, vector<16x32xf32>
    %424 = arith.truncf %423 : vector<16x32xf32> to vector<16x32xbf16>
    %c0_123 = arith.constant 0 : index
    %c0_124 = arith.constant 0 : index
    %425 = vector.load %arg6[%c0_123, %c0_124] : memref<32x128xbf16, #tpu.memory_space<vmem>>, vector<32x128xbf16>
    %cst_125 = arith.constant dense<0.000000e+00> : vector<16x128xf32>
    %426 = tpu.matmul %424, %425, %cst_125 {dimension_numbers = #tpu.dot_dimension_numbers<[1], [0], [0], [1], [0, 0, 1, 1], [], []>} : vector<16x32xbf16>, vector<32x128xbf16>, vector<16x128xf32> -> vector<16x128xf32>
    %c0_126 = arith.constant 0 : index
    %c0_127 = arith.constant 0 : index
    %427 = vector.load %arg7[%c0_126, %c0_127] : memref<1x128xf32, #tpu.memory_space<vmem>>, vector<1x128xf32>
    %428 = vector.broadcast %427 : vector<1x128xf32> to vector<16x128xf32>
    %429 = arith.addf %426, %428 : vector<16x128xf32>
    %c0_128 = arith.constant 0 : index
    %c0_129 = arith.constant 0 : index
    %430 = vector.load %arg8[%c0_128, %c0_129] : memref<16x128xf32, #tpu.memory_space<vmem>>, vector<16x128xf32>
    tpu.vector_store %arg8[%c0_128, %c0_129], %429 {strides = array<i32>} : memref<16x128xf32, #tpu.memory_space<vmem>>, vector<16x128xf32>,
    return
  }
}

</mosaic_0001>

<bundles_post_ra>
// kernel: custom-call
= control target key start
LH: loop header
LB: loop body
LE: loop exit
PB: predicated region body
PF: predicated region fallthrough
CT: control target
= control target key end

     0   :  { %s6_s0 = inlined_call_operand.vmem [shape: s32[16,7], index: 0, kind: output, shape index: {}]  }

// kernel: custom-call.1
= control target key start
LH: loop header
LB: loop body
LE: loop exit
PB: predicated region body
PF: predicated region fallthrough
CT: control target
= control target key end

     0   :  { %s6_s0 = inlined_call_operand.vmem [shape: s32[16], index: 0, kind: output, shape index: {}]  }

// kernel: bilstm_crf_forward.1
= control target key start
LH: loop header
LB: loop body
LE: loop exit
PB: predicated region body
PF: predicated region fallthrough
CT: control target
= control target key end

     0   :  { %v2220_v0 = vmov 0.0   ;;  %vm2221_vm0 = vmmov 0   ;;  %vm76_vm1 = vcmask 523264   ;;  %vm139_vm2 = vcmask 261120   ;;  %s2223_s25 = smov 64   ;;  %s2719_s1 = inlined_call_operand.vmem [shape: bf16[64,128], index: 1, kind: input, shape index: {}]   ;;  %s2720_s3 = inlined_call_operand.vmem [shape: bf16[32,128], index: 3, kind: input, shape index: {}]   ;;  %s2721_s4 = inlined_call_operand.vmem [shape: bf16[8,32], index: 4, kind: input, shape index: {}]   ;;  %s2722_s0 = inlined_call_operand.vmem [shape: bf16[16,64], index: 0, kind: input, shape index: {}]   ;;  %s2723_s2 = inlined_call_operand.vmem [shape: f32[1,128], index: 2, kind: input, shape index: {}]   ;;  %s2724_s5 = inlined_call_operand.vmem [shape: f32[8,32], index: 5, kind: input, shape index: {}]   ;;  %s2725_s6 = inlined_call_operand.vmem [shape: bf16[32,128], index: 6, kind: input, shape index: {}]   ;;  %s2726_s7 = inlined_call_operand.vmem [shape: f32[1,128], index: 7, kind: input, shape index: {}]   ;;  %s2727_s8 = inlined_call_operand.vmem [shape: f32[16,128], index: 8, kind: output, shape index: {}]  }
   0x1   :  { %1901 = vmatprep.subr.bf16.mxu0 %v2220_v0  ;;  %v2053_v1 = vld [vmem:[%s2719_s1] sm:$0xff]   ;;  %1913 = vmatprep.subr.bf16.mxu1 %v2220_v0  ;;  %v2054_v2 = vld [vmem:[%s2719_s1 + $0x8] sm:$0xff]   ;;  %v2055_v5 = vld [vmem:[%s2719_s1 + $0x10] sm:$0xff]   ;;  %v183_v9 = vlaneseq  ;;  %vm221_vm3 = vcmask 122880   ;;  %vm223_vm4 = vcmask 254080  }
   0x2   :  { %1909 = vmatprep.mubr.msk.bf16.mxu0 %vm2221_vm0, %v2220_v0  ;;  %1917 = vmatprep.mubr.msk.bf16.mxu1 %vm2221_vm0, %v2220_v0  ;;  %v2056_v3 = vld [vmem:[%s2720_s3] sm:$0xff]   ;;  %v2058_v4 = vld [vmem:[%s2720_s3 + $0x8] sm:$0xff]   ;;  %v2057_v7 = vld [vmem:[%s2719_s1 + $0x18] sm:$0xff]  }
   0x3   :  { %1902 = vmatpush3.bf16.msra.mxu0 %v2053_v1  ;;  %1914 = vmatpush3.bf16.msra.mxu1 %v2056_v3  ;;  %v121_v6 = vld [vmem:[%s2721_s4] sm:$0xf]  ;;  %v184_v11 = vshrl.u32 %v183_v9, 7  ;;  %v2061_v60 = vld [vmem:[%s2720_s3 + $0x8] sm:$0xff]  }
   0x4   :  { %1903 = vmatprep.subr.bf16.mxu0 %v2220_v0  ;;  %1915 = vmatprep.subr.bf16.mxu1 %v2220_v0  ;;  %v2059_v8 = vld [vmem:[%s2722_s0] sm:$0xff]   ;;  %s2222_s0 = smov 32  }
   0x5   :  { %v1770_v14 = vld [vmem:[%s2723_s2] ss:$0 sm:$0xff]  ;;  %v185_v16 = vsub.s32 0, %v184_v11  ;;  %v289_v17 = vsub.s32 1, %v184_v11  ;;  %v387_v18 = vsub.s32 2, %v184_v11  ;;  %v485_v20 = vsub.s32 3, %v184_v11 }
   0x6   :  { %v583_v21 = vsub.s32 4, %v184_v11  ;;  %v681_v22 = vsub.s32 5, %v184_v11  ;;  %v779_v23 = vsub.s32 6, %v184_v11  ;;  %v877_v26 = vsub.s32 7, %v184_v11  ;;  %v122_v48 = vld [vmem:[%s2724_s5] sm:$0xff] }
   0x7   :  { %1904 = vmatpush3.bf16.msra.mxu0 %v2054_v2  ;;  %1916 = vmatpush3.bf16.msra.mxu1 %v2058_v4  ;;  %v2060_v59 = vld [vmem:[%s2720_s3] sm:$0xff]  }
   0x8   :  { %1905 = vmatprep.subr.bf16.mxu0 %v2220_v0  ;;  %1921 = vmatprep.subr.bf16.mxu1 %v2220_v0 }
   0xa   :  { %1918 = vmatmul.mubr.msk.bf16.vlgmr.msra.gmra.mrb[0].mxu1 %vm139_vm2, %v121_v6 }
   0xb   :  { %1906 = vmatpush3.bf16.msra.mxu0 %v2055_v5  ;;  %1925 = vmatprep.mubr.msk.bf16.mxu1 %vm2221_vm0, %v2220_v0 }
   0xc   :  { %1907 = vmatprep.subr.bf16.mxu0 %v2220_v0  ;;  %1922 = vmatpush3.bf16.msra.mxu1 %v2060_v59 }
   0xd   :  { %1923 = vmatprep.subr.bf16.mxu1 %v2220_v0 }
   0xf   :  { %1908 = vmatpush3.bf16.msra.mxu0 %v2057_v7 }
  0x10   :  { %1929 = vmatprep.subr.bf16.mxu0 %v2220_v0  ;;  %1924 = vmatpush3.bf16.msra.mxu1 %v2061_v60 }
  0x11   :  { %1937 = vmatprep.subr.bf16.mxu1 %v2220_v0 }
  0x12   :  { %1910 = vmatmul.mubr.msk.bf16.vlgmr.msra.gmra.mrb[0].mxu0 %vm76_vm1, %v2059_v8 }
  0x13   :  { %1933 = vmatprep.mubr.msk.bf16.mxu0 %vm2221_vm0, %v2220_v0 }
  0xdd   :  { %v177_v10 = vpop.f32.mrb[0].mxu1 }
  0xde   :  { %v1919_v12 = vpop.f32.mrb[1].mxu1 }
  0xdf   :  { %v180_v13 = vpop.f32.mrb[2].mxu1 }
  0xe0   :  { %v1920_v15 = vpop.f32.mrb[3].mxu1 }
  0xe5   :  { %v114_v19 = vpop.f32.mrb[0].mxu0 }
  0xe6   :  { %v115_v24 = vadd.f32 %v1770_v14, %v114_v19  ;;  %v1911_v25 = vpop.f32.mrb[1].mxu0  ;;  %v2063_v19 = vld [vmem:[%s2720_s3 + $0x8] sm:$0xff]  }
  0xe7   :  { %v117_v27 = vpop.f32.mrb[2].mxu0 }
  0xe8   :  { %v186_v28 = vrot.slane %v115_v24, %v185_v16  ;;  %v118_v29 = vadd.f32 %v1770_v14, %v117_v27  ;;  %v1912_v30 = vpop.f32.mrb[3].mxu0  ;;  %v290_v31 = vrot.slane %v115_v24, %v289_v17  ;;  %v2313_v32 = vrot.slane %v115_v24, %v387_v18 }
  0xe9   :  { %v2315_v33 = vrot.slane %v115_v24, %v485_v20  ;;  %v2317_v34 = vrot.slane %v115_v24, %v583_v21  ;;  %v2319_v35 = vrot.slane %v115_v24, %v681_v22  ;;  %v2321_v36 = vrot.slane %v115_v24, %v779_v23 }
  0xea   :  { %v187_v37 = vadd.f32 %v186_v28, %v177_v10  ;;  %v2323_v38 = vrot.slane %v115_v24, %v877_v26  ;;  %v2325_v39 = vrot.slane %v118_v29, %v185_v16  ;;  %v2327_v40 = vrot.slane %v118_v29, %v289_v17 }
  0xeb   :  { %v2329_v41 = vrot.slane %v118_v29, %v387_v18  ;;  %v2331_v42 = vrot.slane %v118_v29, %v485_v20  ;;  %v2333_v43 = vrot.slane %v118_v29, %v583_v21  ;;  %v2335_v44 = vrot.slane %v118_v29, %v681_v22  ;;  %v2062_v18 = vld [vmem:[%s2720_s3] sm:$0xff]  }
  0xec   :  { %2092 = vtanh.f32 %v187_v37  ;;  %v2337_v45 = vrot.slane %v118_v29, %v779_v23  ;;  %v2339_v46 = vrot.slane %v118_v29, %v877_v26  ;;  %v1780_v49 = vmul.f32 -1.442695, %v187_v37  ;;  %1930 = vmatpush3.bf16.msra.mxu0 %v2062_v18 }
  0xed   :  { %1931 = vmatprep.subr.bf16.mxu0 %v2220_v0 }
  0xee   :  { %2094 = vpow2.f32 %v1780_v49 }
  0xf0   :  { %1932 = vmatpush3.bf16.msra.mxu0 %v2063_v19 }
  0xf1   :  { %1945 = vmatprep.subr.bf16.mxu0 %v2220_v0 }
  0xf6   :  { %v2093_v47 = vpop.eup %2092 }
  0xf7   :  { %201 = vrot.lane.b32.xlu0 %v2093_v47, %s2222_s0 }
  0xf8   :  { %v2095_v50 = vpop.eup %2094 }
  0xf9   :  { %v191_v51 = vadd.f32 1.0, %v2095_v50 }
  0xfb   :  { %196 = vrot.lane.b32.xlu0 %v122_v48, %s2222_s0  ;;  %2096 = vrcp.f32 %v191_v51 }
 0x105   :  { %v2097_v52 = vpop.eup %2096 }
 0x169   :  { %v202_v53 = vpop.permute.xlu0 %201 }
 0x16a   :  { %v204_v54 = vmul.f32 %v2097_v52, %v202_v53  ;;  %v2064_v53 = vld [vmem:[%s2720_s3] sm:$0xff]  }
 0x16c   :  { %206 = vrot.lane.b32.xlu1 %v204_v54, %s2222_s0  ;;  %v2065_v54 = vld [vmem:[%s2720_s3 + $0x8] sm:$0xff]  }
 0x16d   :  { %v197_v55 = vpop.permute.xlu0 %196 }
 0x16e   :  { %v199_v56 = vmul.f32 %v2097_v52, %v197_v55 }
 0x1de   :  { %v207_v57 = vpop.permute.xlu1 %206 }
 0x1df   :  { %v209_v58 = vadd.f32 %v207_v57, %v199_v56 }
 0x1e1   :  { %2098 = vtanh.f32 %v209_v58 }
 0x1eb   :  { %v2099_v61 = vpop.eup %2098 }
 0x1ec   :  { %212 = vrot.lane.b32.xlu1 %v2099_v61, %s2222_s0 }
 0x25e   :  { %v213_v62 = vpop.permute.xlu1 %212 }
 0x25f   :  { %v2356_v63 = vmul.f32 %v2097_v52, %v213_v62 }
 0x261   :  { %v216_v1 = vpack.c.bf16 %v2356_v63, %v2356_v63 }
 0x263   :  { %230 = vrot.lane.b32.xlu0 %v216_v1, %s2223_s25 }
 0x2d5   :  { %v231_v2 = vpop.permute.xlu0 %230 }
 0x2d6   :  { %1926 = vmatmul.mubr.msk.bf16.vlgmr.msra.gmra.mrb[4].mxu1 %vm139_vm2, %v231_v2 }
 0x2d7   :  { %1941 = vmatprep.mubr.msk.bf16.mxu1 %vm2221_vm0, %v2220_v0  ;;  %1938 = vmatpush3.bf16.msra.mxu1 %v2064_v53 }
 0x2d8   :  { %1939 = vmatprep.subr.bf16.mxu1 %v2220_v0 }
 0x2db   :  { %1940 = vmatpush3.bf16.msra.mxu1 %v2065_v54 }
 0x2dc   :  { %1953 = vmatprep.subr.bf16.mxu1 %v2220_v0 }
 0x3a9   :  { %v281_v3 = vpop.f32.mrb[4].mxu1 }
 0x3aa   :  { %v291_v4 = vadd.f32 %v290_v31, %v281_v3  ;;  %v1927_v5 = vpop.f32.mrb[5].mxu1 }
 0x3ab   :  { %v284_v6 = vpop.f32.mrb[6].mxu1 }
 0x3ac   :  { %2100 = vtanh.f32 %v291_v4  ;;  %v1928_v7 = vpop.f32.mrb[7].mxu1  ;;  %v1784_v9 = vmul.f32 -1.442695, %v291_v4 }
 0x3ae   :  { %2102 = vpow2.f32 %v1784_v9 }
 0x3b6   :  { %v2101_v8 = vpop.eup %2100 }
 0x3b7   :  { %301 = vrot.lane.b32.xlu1 %v2101_v8, %s2222_s0 }
 0x3b8   :  { %v2103_v10 = vpop.eup %2102 }
 0x3b9   :  { %v295_v11 = vadd.f32 1.0, %v2103_v10 }
 0x3bb   :  { %2104 = vrcp.f32 %v295_v11 }
 0x3c5   :  { %v2105_v12 = vpop.eup %2104 }
 0x3c6   :  { %v299_v15 = vmul.f32 %v2105_v12, %v209_v58 }
 0x429   :  { %v302_v13 = vpop.permute.xlu1 %301 }
 0x42a   :  { %v304_v14 = vmul.f32 %v2105_v12, %v302_v13  ;;  %v2067_v13 = vld [vmem:[%s2720_s3 + $0x8] sm:$0xff]  }
 0x42c   :  { %306 = vrot.lane.b32.xlu0 %v304_v14, %s2222_s0 }
 0x49e   :  { %v307_v16 = vpop.permute.xlu0 %306 }
 0x49f   :  { %v309_v17 = vadd.f32 %v307_v16, %v299_v15 }
 0x4a1   :  { %2106 = vtanh.f32 %v309_v17 }
 0x4ab   :  { %v2107_v20 = vpop.eup %2106 }
 0x4ac   :  { %312 = vrot.lane.b32.xlu1 %v2107_v20, %s2222_s0 }
 0x51e   :  { %v313_v21 = vpop.permute.xlu1 %312 }
 0x51f   :  { %v2375_v22 = vmul.f32 %v2105_v12, %v313_v21  ;;  %v2066_v12 = vld [vmem:[%s2720_s3] sm:$0xff]  }
 0x521   :  { %v316_v23 = vpack.c.bf16 %v2375_v22, %v2375_v22 }
 0x523   :  { %328 = vrot.lane.b32.xlu0 %v316_v23, %s2223_s25 }
 0x595   :  { %v329_v24 = vpop.permute.xlu0 %328 }
 0x596   :  { %1934 = vmatmul.mubr.msk.bf16.vlgmr.msra.gmra.mrb[4].mxu0 %vm139_vm2, %v329_v24 }
 0x597   :  { %1949 = vmatprep.mubr.msk.bf16.mxu0 %vm2221_vm0, %v2220_v0  ;;  %1946 = vmatpush3.bf16.msra.mxu0 %v2066_v12 }
 0x598   :  { %1947 = vmatprep.subr.bf16.mxu0 %v2220_v0 }
 0x59b   :  { %1948 = vmatpush3.bf16.msra.mxu0 %v2067_v13 }
 0x59c   :  { %1961 = vmatprep.subr.bf16.mxu0 %v2220_v0 }
 0x669   :  { %v379_v25 = vpop.f32.mrb[4].mxu0 }
 0x66a   :  { %v389_v26 = vadd.f32 %v2313_v32, %v379_v25  ;;  %v1935_v27 = vpop.f32.mrb[5].mxu0 }
 0x66b   :  { %v382_v28 = vpop.f32.mrb[6].mxu0 }
 0x66c   :  { %2108 = vtanh.f32 %v389_v26  ;;  %v1936_v29 = vpop.f32.mrb[7].mxu0  ;;  %v1788_v31 = vmul.f32 -1.442695, %v389_v26 }
 0x66e   :  { %2110 = vpow2.f32 %v1788_v31 }
 0x676   :  { %v2109_v30 = vpop.eup %2108 }
 0x677   :  { %399 = vrot.lane.b32.xlu1 %v2109_v30, %s2222_s0 }
 0x678   :  { %v2111_v37 = vpop.eup %2110 }
 0x679   :  { %v393_v47 = vadd.f32 1.0, %v2111_v37 }
 0x67b   :  { %2112 = vrcp.f32 %v393_v47 }
 0x685   :  { %v2113_v48 = vpop.eup %2112 }
 0x686   :  { %v397_v51 = vmul.f32 %v2113_v48, %v309_v17 }
 0x6e9   :  { %v400_v49 = vpop.permute.xlu1 %399 }
 0x6ea   :  { %v402_v50 = vmul.f32 %v2113_v48, %v400_v49  ;;  %v2069_v49 = vld [vmem:[%s2720_s3 + $0x8] sm:$0xff]  }
 0x6ec   :  { %404 = vrot.lane.b32.xlu0 %v402_v50, %s2222_s0 }
 0x75e   :  { %v405_v52 = vpop.permute.xlu0 %404 }
 0x75f   :  { %v407_v32 = vadd.f32 %v405_v52, %v397_v51 }
 0x761   :  { %2114 = vtanh.f32 %v407_v32 }
 0x76b   :  { %v2115_v55 = vpop.eup %2114 }
 0x76c   :  { %410 = vrot.lane.b32.xlu1 %v2115_v55, %s2222_s0 }
 0x7de   :  { %v411_v56 = vpop.permute.xlu1 %410 }
 0x7df   :  { %v2395_v57 = vmul.f32 %v2113_v48, %v411_v56  ;;  %v2068_v48 = vld [vmem:[%s2720_s3] sm:$0xff]  }
 0x7e1   :  { %v414_v58 = vpack.c.bf16 %v2395_v57, %v2395_v57 }
 0x7e3   :  { %426 = vrot.lane.b32.xlu0 %v414_v58, %s2223_s25 }
 0x855   :  { %v427_v59 = vpop.permute.xlu0 %426 }
 0x856   :  { %1942 = vmatmul.mubr.msk.bf16.vlgmr.msra.gmra.mrb[8].mxu1 %vm139_vm2, %v427_v59 }
 0x857   :  { %1957 = vmatprep.mubr.msk.bf16.mxu1 %vm2221_vm0, %v2220_v0  ;;  %1954 = vmatpush3.bf16.msra.mxu1 %v2068_v48 }
 0x858   :  { %1955 = vmatprep.subr.bf16.mxu1 %v2220_v0 }
 0x85b   :  { %1956 = vmatpush3.bf16.msra.mxu1 %v2069_v49 }
 0x85c   :  { %1969 = vmatprep.subr.bf16.mxu1 %v2220_v0 }
 0x929   :  { %v477_v60 = vpop.f32.mrb[8].mxu1 }
 0x92a   :  { %v487_v61 = vadd.f32 %v2315_v33, %v477_v60  ;;  %v1943_v62 = vpop.f32.mrb[9].mxu1 }
 0x92b   :  { %v480_v1 = vpop.f32.mrb[10].mxu1 }
 0x92c   :  { %2116 = vtanh.f32 %v487_v61  ;;  %v1944_v2 = vpop.f32.mrb[11].mxu1  ;;  %v1792_v4 = vmul.f32 -1.442695, %v487_v61 }
 0x92e   :  { %2118 = vpow2.f32 %v1792_v4 }
 0x936   :  { %v2117_v3 = vpop.eup %2116 }
 0x937   :  { %497 = vrot.lane.b32.xlu1 %v2117_v3, %s2222_s0 }
 0x938   :  { %v2119_v5 = vpop.eup %2118 }
 0x939   :  { %v491_v6 = vadd.f32 1.0, %v2119_v5 }
 0x93b   :  { %2120 = vrcp.f32 %v491_v6 }
 0x945   :  { %v2121_v7 = vpop.eup %2120 }
 0x946   :  { %v495_v10 = vmul.f32 %v2121_v7, %v407_v32 }
 0x9a9   :  { %v498_v8 = vpop.permute.xlu1 %497 }
 0x9aa   :  { %v500_v9 = vmul.f32 %v2121_v7, %v498_v8  ;;  %v2071_v8 = vld [vmem:[%s2720_s3 + $0x8] sm:$0xff]  }
 0x9ac   :  { %502 = vrot.lane.b32.xlu0 %v500_v9, %s2222_s0 }
 0xa1e   :  { %v503_v11 = vpop.permute.xlu0 %502 }
 0xa1f   :  { %v505_v33 = vadd.f32 %v503_v11, %v495_v10 }
 0xa21   :  { %2122 = vtanh.f32 %v505_v33 }
 0xa2b   :  { %v2123_v14 = vpop.eup %2122 }
 0xa2c   :  { %508 = vrot.lane.b32.xlu1 %v2123_v14, %s2222_s0 }
 0xa9e   :  { %v509_v15 = vpop.permute.xlu1 %508 }
 0xa9f   :  { %v2415_v16 = vmul.f32 %v2121_v7, %v509_v15  ;;  %v2070_v7 = vld [vmem:[%s2720_s3] sm:$0xff]  }
 0xaa1   :  { %v512_v17 = vpack.c.bf16 %v2415_v16, %v2415_v16 }
 0xaa3   :  { %524 = vrot.lane.b32.xlu0 %v512_v17, %s2223_s25 }
 0xb15   :  { %v525_v18 = vpop.permute.xlu0 %524 }
 0xb16   :  { %1950 = vmatmul.mubr.msk.bf16.vlgmr.msra.gmra.mrb[8].mxu0 %vm139_vm2, %v525_v18 }
 0xb17   :  { %1965 = vmatprep.mubr.msk.bf16.mxu0 %vm2221_vm0, %v2220_v0  ;;  %1962 = vmatpush3.bf16.msra.mxu0 %v2070_v7 }
 0xb18   :  { %1963 = vmatprep.subr.bf16.mxu0 %v2220_v0 }
 0xb1b   :  { %1964 = vmatpush3.bf16.msra.mxu0 %v2071_v8 }
 0xb1c   :  { %1977 = vmatprep.subr.bf16.mxu0 %v2220_v0 }
 0xbe9   :  { %v575_v19 = vpop.f32.mrb[8].mxu0 }
 0xbea   :  { %v585_v20 = vadd.f32 %v2317_v34, %v575_v19  ;;  %v1951_v21 = vpop.f32.mrb[9].mxu0 }
 0xbeb   :  { %v578_v23 = vpop.f32.mrb[10].mxu0 }
 0xbec   :  { %2124 = vtanh.f32 %v585_v20  ;;  %v1952_v24 = vpop.f32.mrb[11].mxu0  ;;  %v1796_v26 = vmul.f32 -1.442695, %v585_v20 }
 0xbee   :  { %2126 = vpow2.f32 %v1796_v26 }
 0xbf6   :  { %v2125_v25 = vpop.eup %2124 }
 0xbf7   :  { %595 = vrot.lane.b32.xlu1 %v2125_v25, %s2222_s0 }
 0xbf8   :  { %v2127_v27 = vpop.eup %2126 }
 0xbf9   :  { %v589_v28 = vadd.f32 1.0, %v2127_v27 }
 0xbfb   :  { %2128 = vrcp.f32 %v589_v28 }
 0xc05   :  { %v2129_v29 = vpop.eup %2128 }
 0xc06   :  { %v593_v37 = vmul.f32 %v2129_v29, %v505_v33 }
 0xc69   :  { %v596_v30 = vpop.permute.xlu1 %595 }
 0xc6a   :  { %v598_v31 = vmul.f32 %v2129_v29, %v596_v30  ;;  %v2073_v30 = vld [vmem:[%s2720_s3 + $0x8] sm:$0xff]  }
 0xc6c   :  { %600 = vrot.lane.b32.xlu0 %v598_v31, %s2222_s0 }
 0xcde   :  { %v601_v47 = vpop.permute.xlu0 %600 }
 0xcdf   :  { %v603_v34 = vadd.f32 %v601_v47, %v593_v37 }
 0xce1   :  { %2130 = vtanh.f32 %v603_v34 }
 0xceb   :  { %v2131_v50 = vpop.eup %2130 }
 0xcec   :  { %606 = vrot.lane.b32.xlu1 %v2131_v50, %s2222_s0 }
 0xd5e   :  { %v607_v51 = vpop.permute.xlu1 %606 }
 0xd5f   :  { %v2435_v52 = vmul.f32 %v2129_v29, %v607_v51  ;;  %v2072_v29 = vld [vmem:[%s2720_s3] sm:$0xff]  }
 0xd61   :  { %v610_v32 = vpack.c.bf16 %v2435_v52, %v2435_v52 }
 0xd63   :  { %622 = vrot.lane.b32.xlu0 %v610_v32, %s2223_s25 }
 0xdd5   :  { %v623_v53 = vpop.permute.xlu0 %622 }
 0xdd6   :  { %1958 = vmatmul.mubr.msk.bf16.vlgmr.msra.gmra.mrb[12].mxu1 %vm139_vm2, %v623_v53 }
 0xdd7   :  { %1973 = vmatprep.mubr.msk.bf16.mxu1 %vm2221_vm0, %v2220_v0  ;;  %1970 = vmatpush3.bf16.msra.mxu1 %v2072_v29 }
 0xdd8   :  { %1971 = vmatprep.subr.bf16.mxu1 %v2220_v0 }
 0xddb   :  { %1972 = vmatpush3.bf16.msra.mxu1 %v2073_v30 }
 0xddc   :  { %1985 = vmatprep.subr.bf16.mxu1 %v2220_v0 }
 0xea9   :  { %v673_v54 = vpop.f32.mrb[12].mxu1 }
 0xeaa   :  { %v683_v55 = vadd.f32 %v2319_v35, %v673_v54  ;;  %v1959_v56 = vpop.f32.mrb[13].mxu1 }
 0xeab   :  { %v676_v58 = vpop.f32.mrb[14].mxu1 }
 0xeac   :  { %2132 = vtanh.f32 %v683_v55  ;;  %v1960_v59 = vpop.f32.mrb[15].mxu1  ;;  %v1800_v61 = vmul.f32 -1.442695, %v683_v55 }
 0xeae   :  { %2134 = vpow2.f32 %v1800_v61 }
 0xeb6   :  { %v2133_v60 = vpop.eup %2132 }
 0xeb7   :  { %693 = vrot.lane.b32.xlu1 %v2133_v60, %s2222_s0 }
 0xeb8   :  { %v2135_v62 = vpop.eup %2134 }
 0xeb9   :  { %v687_v1 = vadd.f32 1.0, %v2135_v62 }
 0xebb   :  { %2136 = vrcp.f32 %v687_v1 }
 0xec5   :  { %v2137_v2 = vpop.eup %2136 }
 0xec6   :  { %v691_v5 = vmul.f32 %v2137_v2, %v603_v34 }
 0xf29   :  { %v694_v3 = vpop.permute.xlu1 %693 }
 0xf2a   :  { %v696_v4 = vmul.f32 %v2137_v2, %v694_v3  ;;  %v2075_v3 = vld [vmem:[%s2720_s3 + $0x8] sm:$0xff]  }
 0xf2c   :  { %698 = vrot.lane.b32.xlu0 %v696_v4, %s2222_s0 }
 0xf9e   :  { %v699_v6 = vpop.permute.xlu0 %698 }
 0xf9f   :  { %v701_v35 = vadd.f32 %v699_v6, %v691_v5 }
 0xfa1   :  { %2138 = vtanh.f32 %v701_v35 }
 0xfab   :  { %v2139_v9 = vpop.eup %2138 }
 0xfac   :  { %704 = vrot.lane.b32.xlu1 %v2139_v9, %s2222_s0 }
0x101e   :  { %v705_v10 = vpop.permute.xlu1 %704 }
0x101f   :  { %v2455_v11 = vmul.f32 %v2137_v2, %v705_v10  ;;  %v2074_v2 = vld [vmem:[%s2720_s3] sm:$0xff]  }
0x1021   :  { %v708_v33 = vpack.c.bf16 %v2455_v11, %v2455_v11 }
0x1023   :  { %720 = vrot.lane.b32.xlu0 %v708_v33, %s2223_s25 }
0x1095   :  { %v721_v12 = vpop.permute.xlu0 %720 }
0x1096   :  { %1966 = vmatmul.mubr.msk.bf16.vlgmr.msra.gmra.mrb[12].mxu0 %vm139_vm2, %v721_v12 }
0x1097   :  { %1981 = vmatprep.mubr.msk.bf16.mxu0 %vm2221_vm0, %v2220_v0  ;;  %1978 = vmatpush3.bf16.msra.mxu0 %v2074_v2 }
0x1098   :  { %1979 = vmatprep.subr.bf16.mxu0 %v2220_v0 }
0x109b   :  { %1980 = vmatpush3.bf16.msra.mxu0 %v2075_v3 }
0x109c   :  { %1993 = vmatprep.subr.bf16.mxu0 %v2220_v0 }
0x1169   :  { %v771_v13 = vpop.f32.mrb[12].mxu0 }
0x116a   :  { %v781_v14 = vadd.f32 %v2321_v36, %v771_v13  ;;  %v1967_v15 = vpop.f32.mrb[13].mxu0 }
0x116b   :  { %v774_v17 = vpop.f32.mrb[14].mxu0 }
0x116c   :  { %2140 = vtanh.f32 %v781_v14  ;;  %v1968_v18 = vpop.f32.mrb[15].mxu0  ;;  %v1804_v20 = vmul.f32 -1.442695, %v781_v14 }
0x116e   :  { %2142 = vpow2.f32 %v1804_v20 }
0x1176   :  { %v2141_v19 = vpop.eup %2140 }
0x1177   :  { %791 = vrot.lane.b32.xlu1 %v2141_v19, %s2222_s0 }
0x1178   :  { %v2143_v21 = vpop.eup %2142 }
0x1179   :  { %v785_v23 = vadd.f32 1.0, %v2143_v21 }
0x117b   :  { %2144 = vrcp.f32 %v785_v23 }
0x1185   :  { %v2145_v24 = vpop.eup %2144 }
0x1186   :  { %v789_v27 = vmul.f32 %v2145_v24, %v701_v35 }
0x11e9   :  { %v792_v25 = vpop.permute.xlu1 %791 }
0x11ea   :  { %v794_v26 = vmul.f32 %v2145_v24, %v792_v25  ;;  %v2077_v25 = vld [vmem:[%s2720_s3 + $0x8] sm:$0xff]  }
0x11ec   :  { %796 = vrot.lane.b32.xlu0 %v794_v26, %s2222_s0 }
0x125e   :  { %v797_v28 = vpop.permute.xlu0 %796 }
0x125f   :  { %v799_v36 = vadd.f32 %v797_v28, %v789_v27 }
0x1261   :  { %2146 = vtanh.f32 %v799_v36 }
0x126b   :  { %v2147_v31 = vpop.eup %2146 }
0x126c   :  { %802 = vrot.lane.b32.xlu1 %v2147_v31, %s2222_s0 }
0x12de   :  { %v803_v37 = vpop.permute.xlu1 %802 }
0x12df   :  { %v2475_v47 = vmul.f32 %v2145_v24, %v803_v37  ;;  %v2076_v24 = vld [vmem:[%s2720_s3] sm:$0xff]  }
0x12e1   :  { %v806_v34 = vpack.c.bf16 %v2475_v47, %v2475_v47 }
0x12e3   :  { %818 = vrot.lane.b32.xlu0 %v806_v34, %s2223_s25 }
0x1355   :  { %v819_v48 = vpop.permute.xlu0 %818 }
0x1356   :  { %1974 = vmatmul.mubr.msk.bf16.vlgmr.msra.gmra.mrb[16].mxu1 %vm139_vm2, %v819_v48 }
0x1357   :  { %1989 = vmatprep.mubr.msk.bf16.mxu1 %vm2221_vm0, %v2220_v0  ;;  %1986 = vmatpush3.bf16.msra.mxu1 %v2076_v24 }
0x1358   :  { %1987 = vmatprep.subr.bf16.mxu1 %v2220_v0 }
0x135b   :  { %1988 = vmatpush3.bf16.msra.mxu1 %v2077_v25 }
0x135c   :  { %2001 = vmatprep.subr.bf16.mxu1 %v2220_v0 }
0x1429   :  { %v869_v49 = vpop.f32.mrb[16].mxu1 }
0x142a   :  { %v879_v50 = vadd.f32 %v2323_v38, %v869_v49  ;;  %v1975_v51 = vpop.f32.mrb[17].mxu1 }
0x142b   :  { %v872_v32 = vpop.f32.mrb[18].mxu1 }
0x142c   :  { %2148 = vtanh.f32 %v879_v50  ;;  %v1976_v53 = vpop.f32.mrb[19].mxu1  ;;  %v1808_v55 = vmul.f32 -1.442695, %v879_v50 }
0x142e   :  { %2150 = vpow2.f32 %v1808_v55 }
0x1436   :  { %v2149_v54 = vpop.eup %2148 }
0x1437   :  { %889 = vrot.lane.b32.xlu1 %v2149_v54, %s2222_s0 }
0x1438   :  { %v2151_v56 = vpop.eup %2150 }
0x1439   :  { %v883_v58 = vadd.f32 1.0, %v2151_v56 }
0x143b   :  { %2152 = vrcp.f32 %v883_v58 }
0x1445   :  { %v2153_v59 = vpop.eup %2152 }
0x1446   :  { %v887_v62 = vmul.f32 %v2153_v59, %v799_v36 }
0x14a9   :  { %v890_v60 = vpop.permute.xlu1 %889 }
0x14aa   :  { %v892_v61 = vmul.f32 %v2153_v59, %v890_v60  ;;  %v2079_v60 = vld [vmem:[%s2720_s3 + $0x8] sm:$0xff]  }
0x14ac   :  { %894 = vrot.lane.b32.xlu0 %v892_v61, %s2222_s0 }
0x151e   :  { %v895_v1 = vpop.permute.xlu0 %894 }
0x151f   :  { %v897_v38 = vadd.f32 %v895_v1, %v887_v62 }
0x1521   :  { %2154 = vtanh.f32 %v897_v38 }
0x152b   :  { %v2155_v4 = vpop.eup %2154 }
0x152c   :  { %900 = vrot.lane.b32.xlu1 %v2155_v4, %s2222_s0 }
0x159e   :  { %v901_v5 = vpop.permute.xlu1 %900 }
0x159f   :  { %v2495_v6 = vmul.f32 %v2153_v59, %v901_v5  ;;  %v2078_v59 = vld [vmem:[%s2720_s3] sm:$0xff]  }
0x15a1   :  { %v904_v35 = vpack.c.bf16 %v2495_v6, %v2495_v6 }
0x15a3   :  { %916 = vrot.lane.b32.xlu0 %v904_v35, %s2223_s25 }
0x1615   :  { %v917_v7 = vpop.permute.xlu0 %916 }
0x1616   :  { %1982 = vmatmul.mubr.msk.bf16.vlgmr.msra.gmra.mrb[16].mxu0 %vm139_vm2, %v917_v7 }
0x1617   :  { %1997 = vmatprep.mubr.msk.bf16.mxu0 %vm2221_vm0, %v2220_v0  ;;  %1994 = vmatpush3.bf16.msra.mxu0 %v2078_v59 }
0x1618   :  { %1995 = vmatprep.subr.bf16.mxu0 %v2220_v0 }
0x161b   :  { %1996 = vmatpush3.bf16.msra.mxu0 %v2079_v60 }
0x161c   :  { %2009 = vmatprep.subr.bf16.mxu0 %v2220_v0 }
0x16e9   :  { %v967_v8 = vpop.f32.mrb[16].mxu0 }
0x16ea   :  { %v977_v9 = vadd.f32 %v2325_v39, %v967_v8  ;;  %v1983_v10 = vpop.f32.mrb[17].mxu0 }
0x16eb   :  { %v970_v33 = vpop.f32.mrb[18].mxu0 }
0x16ec   :  { %2156 = vtanh.f32 %v977_v9  ;;  %v1984_v12 = vpop.f32.mrb[19].mxu0  ;;  %v1812_v14 = vmul.f32 -1.442695, %v977_v9 }
0x16ee   :  { %2158 = vpow2.f32 %v1812_v14 }
0x16f6   :  { %v2157_v13 = vpop.eup %2156 }
0x16f7   :  { %987 = vrot.lane.b32.xlu1 %v2157_v13, %s2222_s0 }
0x16f8   :  { %v2159_v15 = vpop.eup %2158 }
0x16f9   :  { %v981_v17 = vadd.f32 1.0, %v2159_v15 }
0x16fb   :  { %2160 = vrcp.f32 %v981_v17 }
0x1705   :  { %v2161_v18 = vpop.eup %2160 }
0x1706   :  { %v985_v21 = vmul.f32 %v2161_v18, %v897_v38 }
0x1769   :  { %v988_v19 = vpop.permute.xlu1 %987 }
0x176a   :  { %v990_v20 = vmul.f32 %v2161_v18, %v988_v19  ;;  %v2081_v19 = vld [vmem:[%s2720_s3 + $0x8] sm:$0xff]  }
0x176c   :  { %992 = vrot.lane.b32.xlu0 %v990_v20, %s2222_s0 }
0x17de   :  { %v993_v23 = vpop.permute.xlu0 %992 }
0x17df   :  { %v995_v39 = vadd.f32 %v993_v23, %v985_v21 }
0x17e1   :  { %2162 = vtanh.f32 %v995_v39 }
0x17eb   :  { %v2163_v26 = vpop.eup %2162 }
0x17ec   :  { %998 = vrot.lane.b32.xlu1 %v2163_v26, %s2222_s0 }
0x185e   :  { %v999_v27 = vpop.permute.xlu1 %998 }
0x185f   :  { %v2515_v28 = vmul.f32 %v2161_v18, %v999_v27  ;;  %v2080_v18 = vld [vmem:[%s2720_s3] sm:$0xff]  }
0x1861   :  { %v1002_v36 = vpack.c.bf16 %v2515_v28, %v2515_v28 }
0x1863   :  { %1014 = vrot.lane.b32.xlu0 %v1002_v36, %s2223_s25 }
0x18d5   :  { %v1015_v29 = vpop.permute.xlu0 %1014 }
0x18d6   :  { %1990 = vmatmul.mubr.msk.bf16.vlgmr.msra.gmra.mrb[20].mxu1 %vm139_vm2, %v1015_v29 }
0x18d7   :  { %2005 = vmatprep.mubr.msk.bf16.mxu1 %vm2221_vm0, %v2220_v0  ;;  %2002 = vmatpush3.bf16.msra.mxu1 %v2080_v18 }
0x18d8   :  { %2003 = vmatprep.subr.bf16.mxu1 %v2220_v0 }
0x18db   :  { %2004 = vmatpush3.bf16.msra.mxu1 %v2081_v19 }
0x18dc   :  { %2017 = vmatprep.subr.bf16.mxu1 %v2220_v0 }
0x19a9   :  { %v1065_v30 = vpop.f32.mrb[20].mxu1 }
0x19aa   :  { %v1075_v31 = vadd.f32 %v2327_v40, %v1065_v30  ;;  %v1991_v37 = vpop.f32.mrb[21].mxu1 }
0x19ab   :  { %v1068_v34 = vpop.f32.mrb[22].mxu1 }
0x19ac   :  { %2164 = vtanh.f32 %v1075_v31  ;;  %v1992_v48 = vpop.f32.mrb[23].mxu1  ;;  %v1816_v50 = vmul.f32 -1.442695, %v1075_v31 }
0x19ae   :  { %2166 = vpow2.f32 %v1816_v50 }
0x19b6   :  { %v2165_v49 = vpop.eup %2164 }
0x19b7   :  { %1085 = vrot.lane.b32.xlu1 %v2165_v49, %s2222_s0 }
0x19b8   :  { %v2167_v51 = vpop.eup %2166 }
0x19b9   :  { %v1079_v32 = vadd.f32 1.0, %v2167_v51 }
0x19bb   :  { %2168 = vrcp.f32 %v1079_v32 }
0x19c5   :  { %v2169_v53 = vpop.eup %2168 }
0x19c6   :  { %v1083_v56 = vmul.f32 %v2169_v53, %v995_v39 }
0x1a29   :  { %v1086_v54 = vpop.permute.xlu1 %1085 }
0x1a2a   :  { %v1088_v55 = vmul.f32 %v2169_v53, %v1086_v54  ;;  %v2083_v54 = vld [vmem:[%s2720_s3 + $0x8] sm:$0xff]  }
0x1a2c   :  { %1090 = vrot.lane.b32.xlu0 %v1088_v55, %s2222_s0 }
0x1a9e   :  { %v1091_v58 = vpop.permute.xlu0 %1090 }
0x1a9f   :  { %v1093_v40 = vadd.f32 %v1091_v58, %v1083_v56 }
0x1aa1   :  { %2170 = vtanh.f32 %v1093_v40 }
0x1aab   :  { %v2171_v61 = vpop.eup %2170 }
0x1aac   :  { %1096 = vrot.lane.b32.xlu1 %v2171_v61, %s2222_s0 }
0x1b1e   :  { %v1097_v62 = vpop.permute.xlu1 %1096 }
0x1b1f   :  { %v2535_v1 = vmul.f32 %v2169_v53, %v1097_v62  ;;  %v2082_v53 = vld [vmem:[%s2720_s3] sm:$0xff]  }
0x1b21   :  { %v1100_v38 = vpack.c.bf16 %v2535_v1, %v2535_v1 }
0x1b23   :  { %1112 = vrot.lane.b32.xlu0 %v1100_v38, %s2223_s25 }
0x1b95   :  { %v1113_v2 = vpop.permute.xlu0 %1112 }
0x1b96   :  { %1998 = vmatmul.mubr.msk.bf16.vlgmr.msra.gmra.mrb[20].mxu0 %vm139_vm2, %v1113_v2 }
0x1b97   :  { %2013 = vmatprep.mubr.msk.bf16.mxu0 %vm2221_vm0, %v2220_v0  ;;  %2010 = vmatpush3.bf16.msra.mxu0 %v2082_v53 }
0x1b98   :  { %2011 = vmatprep.subr.bf16.mxu0 %v2220_v0 }
0x1b9b   :  { %2012 = vmatpush3.bf16.msra.mxu0 %v2083_v54 }
0x1b9c   :  { %2025 = vmatprep.subr.bf16.mxu0 %v2220_v0 }
0x1c69   :  { %v1163_v3 = vpop.f32.mrb[20].mxu0 }
0x1c6a   :  { %v1173_v4 = vadd.f32 %v2329_v41, %v1163_v3  ;;  %v1999_v5 = vpop.f32.mrb[21].mxu0 }
0x1c6b   :  { %v1166_v35 = vpop.f32.mrb[22].mxu0 }
0x1c6c   :  { %2172 = vtanh.f32 %v1173_v4  ;;  %v2000_v7 = vpop.f32.mrb[23].mxu0  ;;  %v1820_v9 = vmul.f32 -1.442695, %v1173_v4 }
0x1c6e   :  { %2174 = vpow2.f32 %v1820_v9 }
0x1c76   :  { %v2173_v8 = vpop.eup %2172 }
0x1c77   :  { %1183 = vrot.lane.b32.xlu1 %v2173_v8, %s2222_s0 }
0x1c78   :  { %v2175_v10 = vpop.eup %2174 }
0x1c79   :  { %v1177_v33 = vadd.f32 1.0, %v2175_v10 }
0x1c7b   :  { %2176 = vrcp.f32 %v1177_v33 }
0x1c85   :  { %v2177_v12 = vpop.eup %2176 }
0x1c86   :  { %v1181_v15 = vmul.f32 %v2177_v12, %v1093_v40 }
0x1ce9   :  { %v1184_v13 = vpop.permute.xlu1 %1183 }
0x1cea   :  { %v1186_v14 = vmul.f32 %v2177_v12, %v1184_v13  ;;  %v2085_v13 = vld [vmem:[%s2720_s3 + $0x8] sm:$0xff]  }
0x1cec   :  { %1188 = vrot.lane.b32.xlu0 %v1186_v14, %s2222_s0 }
0x1d5e   :  { %v1189_v17 = vpop.permute.xlu0 %1188 }
0x1d5f   :  { %v1191_v41 = vadd.f32 %v1189_v17, %v1181_v15 }
0x1d61   :  { %2178 = vtanh.f32 %v1191_v41 }
0x1d6b   :  { %v2179_v20 = vpop.eup %2178 }
0x1d6c   :  { %1194 = vrot.lane.b32.xlu1 %v2179_v20, %s2222_s0 }
0x1dde   :  { %v1195_v21 = vpop.permute.xlu1 %1194 }
0x1ddf   :  { %v2555_v23 = vmul.f32 %v2177_v12, %v1195_v21  ;;  %v2084_v12 = vld [vmem:[%s2720_s3] sm:$0xff]  }
0x1de1   :  { %v1198_v39 = vpack.c.bf16 %v2555_v23, %v2555_v23 }
0x1de3   :  { %1210 = vrot.lane.b32.xlu0 %v1198_v39, %s2223_s25 }
0x1e55   :  { %v1211_v24 = vpop.permute.xlu0 %1210 }
0x1e56   :  { %2006 = vmatmul.mubr.msk.bf16.vlgmr.msra.gmra.mrb[24].mxu1 %vm139_vm2, %v1211_v24 }
0x1e57   :  { %2021 = vmatprep.mubr.msk.bf16.mxu1 %vm2221_vm0, %v2220_v0  ;;  %2018 = vmatpush3.bf16.msra.mxu1 %v2084_v12 }
0x1e58   :  { %2019 = vmatprep.subr.bf16.mxu1 %v2220_v0 }
0x1e5b   :  { %2020 = vmatpush3.bf16.msra.mxu1 %v2085_v13 }
0x1e5c   :  { %2033 = vmatprep.subr.bf16.mxu1 %v2220_v0 }
0x1f29   :  { %v1261_v25 = vpop.f32.mrb[24].mxu1 }
0x1f2a   :  { %v1271_v26 = vadd.f32 %v2331_v42, %v1261_v25  ;;  %v2007_v27 = vpop.f32.mrb[25].mxu1 }
0x1f2b   :  { %v1264_v36 = vpop.f32.mrb[26].mxu1 }
0x1f2c   :  { %2180 = vtanh.f32 %v1271_v26  ;;  %v2008_v29 = vpop.f32.mrb[27].mxu1  ;;  %v1824_v31 = vmul.f32 -1.442695, %v1271_v26 }
0x1f2e   :  { %2182 = vpow2.f32 %v1824_v31 }
0x1f36   :  { %v2181_v30 = vpop.eup %2180 }
0x1f37   :  { %1281 = vrot.lane.b32.xlu1 %v2181_v30, %s2222_s0 }
0x1f38   :  { %v2183_v37 = vpop.eup %2182 }
0x1f39   :  { %v1275_v34 = vadd.f32 1.0, %v2183_v37 }
0x1f3b   :  { %2184 = vrcp.f32 %v1275_v34 }
0x1f45   :  { %v2185_v48 = vpop.eup %2184 }
0x1f46   :  { %v1279_v51 = vmul.f32 %v2185_v48, %v1191_v41 }
0x1fa9   :  { %v1282_v49 = vpop.permute.xlu1 %1281 }
0x1faa   :  { %v1284_v50 = vmul.f32 %v2185_v48, %v1282_v49  ;;  %v2087_v49 = vld [vmem:[%s2720_s3 + $0x8] sm:$0xff]  }
0x1fac   :  { %1286 = vrot.lane.b32.xlu0 %v1284_v50, %s2222_s0 }
0x201e   :  { %v1287_v32 = vpop.permute.xlu0 %1286 }
0x201f   :  { %v1289_v42 = vadd.f32 %v1287_v32, %v1279_v51 }
0x2021   :  { %2186 = vtanh.f32 %v1289_v42 }
0x202b   :  { %v2187_v55 = vpop.eup %2186 }
0x202c   :  { %1292 = vrot.lane.b32.xlu1 %v2187_v55, %s2222_s0 }
0x209e   :  { %v1293_v56 = vpop.permute.xlu1 %1292 }
0x209f   :  { %v2575_v58 = vmul.f32 %v2185_v48, %v1293_v56  ;;  %v2086_v48 = vld [vmem:[%s2720_s3] sm:$0xff]  }
0x20a1   :  { %v1296_v40 = vpack.c.bf16 %v2575_v58, %v2575_v58 }
0x20a3   :  { %1308 = vrot.lane.b32.xlu0 %v1296_v40, %s2223_s25 }
0x2115   :  { %v1309_v59 = vpop.permute.xlu0 %1308 }
0x2116   :  { %2014 = vmatmul.mubr.msk.bf16.vlgmr.msra.gmra.mrb[24].mxu0 %vm139_vm2, %v1309_v59 }
0x2117   :  { %2029 = vmatprep.mubr.msk.bf16.mxu0 %vm2221_vm0, %v2220_v0  ;;  %2026 = vmatpush3.bf16.msra.mxu0 %v2086_v48 }
0x2118   :  { %2027 = vmatprep.subr.bf16.mxu0 %v2220_v0 }
0x211b   :  { %2028 = vmatpush3.bf16.msra.mxu0 %v2087_v49 }
0x211c   :  { %2041 = vmatprep.subr.bf16.mxu0 %v2220_v0 }
0x21e9   :  { %v1359_v60 = vpop.f32.mrb[24].mxu0 }
0x21ea   :  { %v1369_v61 = vadd.f32 %v2333_v43, %v1359_v60  ;;  %v2015_v62 = vpop.f32.mrb[25].mxu0 }
0x21eb   :  { %v1362_v38 = vpop.f32.mrb[26].mxu0 }
0x21ec   :  { %2188 = vtanh.f32 %v1369_v61  ;;  %v2016_v2 = vpop.f32.mrb[27].mxu0  ;;  %v1828_v4 = vmul.f32 -1.442695, %v1369_v61 }
0x21ee   :  { %2190 = vpow2.f32 %v1828_v4 }
0x21f6   :  { %v2189_v3 = vpop.eup %2188 }
0x21f7   :  { %1379 = vrot.lane.b32.xlu1 %v2189_v3, %s2222_s0 }
0x21f8   :  { %v2191_v5 = vpop.eup %2190 }
0x21f9   :  { %v1373_v35 = vadd.f32 1.0, %v2191_v5 }
0x21fb   :  { %2192 = vrcp.f32 %v1373_v35 }
0x2205   :  { %v2193_v7 = vpop.eup %2192 }
0x2206   :  { %v1377_v10 = vmul.f32 %v2193_v7, %v1289_v42 }
0x2269   :  { %v1380_v8 = vpop.permute.xlu1 %1379 }
0x226a   :  { %v1382_v9 = vmul.f32 %v2193_v7, %v1380_v8  ;;  %v2089_v8 = vld [vmem:[%s2720_s3 + $0x8] sm:$0xff]  }
0x226c   :  { %1384 = vrot.lane.b32.xlu0 %v1382_v9, %s2222_s0 }
0x22de   :  { %v1385_v33 = vpop.permute.xlu0 %1384 }
0x22df   :  { %v1387_v43 = vadd.f32 %v1385_v33, %v1377_v10 }
0x22e1   :  { %2194 = vtanh.f32 %v1387_v43 }
0x22eb   :  { %v2195_v14 = vpop.eup %2194 }
0x22ec   :  { %1390 = vrot.lane.b32.xlu1 %v2195_v14, %s2222_s0 }
0x235e   :  { %v1391_v15 = vpop.permute.xlu1 %1390 }
0x235f   :  { %v2595_v17 = vmul.f32 %v2193_v7, %v1391_v15  ;;  %v2088_v7 = vld [vmem:[%s2720_s3] sm:$0xff]  }
0x2361   :  { %v1394_v41 = vpack.c.bf16 %v2595_v17, %v2595_v17 }
0x2363   :  { %1406 = vrot.lane.b32.xlu0 %v1394_v41, %s2223_s25 }
0x23d5   :  { %v1407_v18 = vpop.permute.xlu0 %1406 }
0x23d6   :  { %2022 = vmatmul.mubr.msk.bf16.vlgmr.msra.gmra.mrb[28].mxu1 %vm139_vm2, %v1407_v18 }
0x23d7   :  { %2037 = vmatprep.mubr.msk.bf16.mxu1 %vm2221_vm0, %v2220_v0  ;;  %2034 = vmatpush3.bf16.msra.mxu1 %v2088_v7 }
0x23d8   :  { %2035 = vmatprep.subr.bf16.mxu1 %v2220_v0 }
0x23db   :  { %2036 = vmatpush3.bf16.msra.mxu1 %v2089_v8 }
0x24a9   :  { %v1457_v19 = vpop.f32.mrb[28].mxu1 }
0x24aa   :  { %v1467_v20 = vadd.f32 %v2335_v44, %v1457_v19  ;;  %v2023_v21 = vpop.f32.mrb[29].mxu1 }
0x24ab   :  { %v1460_v39 = vpop.f32.mrb[30].mxu1 }
0x24ac   :  { %2196 = vtanh.f32 %v1467_v20  ;;  %v2024_v24 = vpop.f32.mrb[31].mxu1  ;;  %v1832_v26 = vmul.f32 -1.442695, %v1467_v20 }
0x24ae   :  { %2198 = vpow2.f32 %v1832_v26 }
0x24b6   :  { %v2197_v25 = vpop.eup %2196 }
0x24b7   :  { %1477 = vrot.lane.b32.xlu1 %v2197_v25, %s2222_s0 }
0x24b8   :  { %v2199_v27 = vpop.eup %2198 }
0x24b9   :  { %v1471_v36 = vadd.f32 1.0, %v2199_v27 }
0x24bb   :  { %2200 = vrcp.f32 %v1471_v36 }
0x24c5   :  { %v2201_v29 = vpop.eup %2200 }
0x24c6   :  { %v1475_v37 = vmul.f32 %v2201_v29, %v1387_v43 }
0x2529   :  { %v1478_v30 = vpop.permute.xlu1 %1477 }
0x252a   :  { %v1480_v31 = vmul.f32 %v2201_v29, %v1478_v30 }
0x252c   :  { %1482 = vrot.lane.b32.xlu0 %v1480_v31, %s2222_s0 }
0x259e   :  { %v1483_v34 = vpop.permute.xlu0 %1482 }
0x259f   :  { %v1485_v44 = vadd.f32 %v1483_v34, %v1475_v37 }
0x25a1   :  { %2202 = vtanh.f32 %v1485_v44 }
0x25ab   :  { %v2203_v50 = vpop.eup %2202 }
0x25ac   :  { %1488 = vrot.lane.b32.xlu1 %v2203_v50, %s2222_s0 }
0x261e   :  { %v1489_v51 = vpop.permute.xlu1 %1488 }
0x261f   :  { %v2615_v32 = vmul.f32 %v2201_v29, %v1489_v51 }
0x2621   :  { %v1492_v42 = vpack.c.bf16 %v2615_v32, %v2615_v32 }
0x2623   :  { %1504 = vrot.lane.b32.xlu0 %v1492_v42, %s2223_s25 }
0x2695   :  { %v1505_v53 = vpop.permute.xlu0 %1504 }
0x2696   :  { %2030 = vmatmul.mubr.msk.bf16.vlgmr.msra.gmra.mrb[28].mxu0 %vm139_vm2, %v1505_v53 }
0x2697   :  { %2045 = vmatprep.mubr.msk.bf16.mxu0 %vm2221_vm0, %v2220_v0 }
0x2769   :  { %v1555_v54 = vpop.f32.mrb[28].mxu0 }
0x276a   :  { %v1565_v55 = vadd.f32 %v2337_v45, %v1555_v54  ;;  %v2031_v56 = vpop.f32.mrb[29].mxu0 }
0x276b   :  { %v1558_v40 = vpop.f32.mrb[30].mxu0 }
0x276c   :  { %2204 = vtanh.f32 %v1565_v55  ;;  %v2032_v59 = vpop.f32.mrb[31].mxu0  ;;  %v1836_v61 = vmul.f32 -1.442695, %v1565_v55 }
0x276e   :  { %2206 = vpow2.f32 %v1836_v61 }
0x2776   :  { %v2205_v60 = vpop.eup %2204 }
0x2777   :  { %1575 = vrot.lane.b32.xlu1 %v2205_v60, %s2222_s0 }
0x2778   :  { %v2207_v62 = vpop.eup %2206 }
0x2779   :  { %v1569_v38 = vadd.f32 1.0, %v2207_v62 }
0x277b   :  { %2208 = vrcp.f32 %v1569_v38 }
0x2785   :  { %v2209_v2 = vpop.eup %2208 }
0x2786   :  { %v1573_v5 = vmul.f32 %v2209_v2, %v1485_v44 }
0x27e9   :  { %v1576_v3 = vpop.permute.xlu1 %1575 }
0x27ea   :  { %v1578_v4 = vmul.f32 %v2209_v2, %v1576_v3 }
0x27ec   :  { %1580 = vrot.lane.b32.xlu0 %v1578_v4, %s2222_s0 }
0x285e   :  { %v1581_v35 = vpop.permute.xlu0 %1580 }
0x285f   :  { %v1583_v45 = vadd.f32 %v1581_v35, %v1573_v5 }
0x2861   :  { %2210 = vtanh.f32 %v1583_v45 }
0x286b   :  { %v2211_v9 = vpop.eup %2210 }
0x286c   :  { %1586 = vrot.lane.b32.xlu1 %v2211_v9, %s2222_s0 }
0x28de   :  { %v1587_v10 = vpop.permute.xlu1 %1586 }
0x28df   :  { %v1589_v33 = vmul.f32 %v2209_v2, %v1587_v10 }
0x28e1   :  { %v1590_v43 = vpack.c.bf16 %v1589_v33, %v1589_v33 }
0x28e3   :  { %1602 = vrot.lane.b32.xlu0 %v1590_v43, %s2223_s25 }
0x2955   :  { %v1603_v12 = vpop.permute.xlu0 %1602 }
0x2956   :  { %2038 = vmatmul.mubr.msk.bf16.vlgmr.msra.gmra.mrb[32].mxu1 %vm139_vm2, %v1603_v12 }
0x2a29   :  { %v1653_v13 = vpop.f32.mrb[32].mxu1 }
0x2a2a   :  { %v1663_v14 = vadd.f32 %v2339_v46, %v1653_v13  ;;  %v2039_v15 = vpop.f32.mrb[33].mxu1 }
0x2a2b   :  { %v1656_v41 = vpop.f32.mrb[34].mxu1 }
0x2a2c   :  { %2212 = vtanh.f32 %v1663_v14  ;;  %v2040_v18 = vpop.f32.mrb[35].mxu1  ;;  %v1840_v20 = vmul.f32 -1.442695, %v1663_v14 }
0x2a2e   :  { %2214 = vpow2.f32 %v1840_v20 }
0x2a36   :  { %v2213_v19 = vpop.eup %2212 }
0x2a37   :  { %1673 = vrot.lane.b32.xlu1 %v2213_v19, %s2222_s0 }
0x2a38   :  { %v2215_v21 = vpop.eup %2214 }
0x2a39   :  { %v1667_v39 = vadd.f32 1.0, %v2215_v21 }
0x2a3b   :  { %2216 = vrcp.f32 %v1667_v39 }
0x2a45   :  { %v2217_v24 = vpop.eup %2216 }
0x2a46   :  { %v1671_v46 = vmul.f32 %v2217_v24, %v1583_v45 }
0x2aa9   :  { %v1674_v25 = vpop.permute.xlu1 %1673 }
0x2aaa   :  { %v1676_v26 = vmul.f32 %v2217_v24, %v1674_v25 }
0x2aac   :  { %1678 = vrot.lane.b32.xlu0 %v1676_v26, %s2222_s0 }
0x2ab0   :  { %218 = vrot.lane.b32.xlu0 %v2356_v63, %s2223_s25 }
0x2ab4   :  { %416 = vrot.lane.b32.xlu0 %v2395_v57, %s2223_s25 }
0x2ab8   :  { %612 = vrot.lane.b32.xlu0 %v2435_v52, %s2223_s25 }
0x2abc   :  { %808 = vrot.lane.b32.xlu0 %v2475_v47, %s2223_s25 }
0x2ac0   :  { %1004 = vrot.lane.b32.xlu0 %v2515_v28, %s2223_s25 }
0x2ac4   :  { %1200 = vrot.lane.b32.xlu0 %v2555_v23, %s2223_s25 }
0x2ac8   :  { %1396 = vrot.lane.b32.xlu0 %v2595_v17, %s2223_s25 }
0x2acc   :  { %1592 = vrot.lane.b32.xlu0 %v1589_v33, %s2223_s25 }
0x2b1e   :  { %v1679_v63 = vpop.permute.xlu0 %1678 }
0x2b1f   :  { %v1681_v57 = vadd.f32 %v1679_v63, %v1671_v46 }
0x2b21   :  { %2218 = vtanh.f32 %v1681_v57 }
0x2b22   :  { %v219_v52 = vpop.permute.xlu0 %218 }
0x2b23   :  { %222 = vst.msk [vmem:[#allocation2] sm:$0x1] %vm221_vm3, %v219_v52 }
0x2b24   :  { %224 = vst.msk [vmem:[#allocation2 + $0xf] sm:$0x1] %vm223_vm4, %v219_v52 }
0x2b26   :  { %v417_v47 = vpop.permute.xlu0 %416 }
0x2b27   :  { %419 = vst.msk [vmem:[#allocation2 + $0x2] sm:$0x1] %vm221_vm3, %v417_v47 }
0x2b28   :  { %420 = vst.msk [vmem:[#allocation2 + $0xd] sm:$0x1] %vm223_vm4, %v417_v47 }
0x2b2a   :  { %v613_v28 = vpop.permute.xlu0 %612 }
0x2b2b   :  { %v2219_v23 = vpop.eup %2218  ;;  %615 = vst.msk [vmem:[#allocation2 + $0x4] sm:$0x1] %vm221_vm3, %v613_v28 }
0x2b2c   :  { %616 = vst.msk [vmem:[#allocation2 + $0xb] sm:$0x1] %vm223_vm4, %v613_v28  ;;  %1684 = vrot.lane.b32.xlu1 %v2219_v23, %s2222_s0 }
0x2b2e   :  { %v809_v17 = vpop.permute.xlu0 %808 }
0x2b2f   :  { %811 = vst.msk [vmem:[#allocation2 + $0x6] sm:$0x1] %vm221_vm3, %v809_v17 }
0x2b30   :  { %812 = vst.msk [vmem:[#allocation2 + $0x9] sm:$0x1] %vm223_vm4, %v809_v17  ;;  %318 = vrot.lane.b32.xlu1 %v2375_v22, %s2223_s25  ;;  %v2090_v22 = vld [vmem:[%s2725_s6] sm:$0xff]  }
0x2b31   :  { %2042 = vmatpush3.bf16.msra.mxu0 %v2090_v22 }
0x2b32   :  { %v1005_v27 = vpop.permute.xlu0 %1004  ;;  %2043 = vmatprep.subr.bf16.mxu0 %v2220_v0 }
0x2b34   :  { %514 = vrot.lane.b32.xlu1 %v2415_v16, %s2223_s25 }
0x2b36   :  { %v1201_v16 = vpop.permute.xlu0 %1200 }
0x2b38   :  { %710 = vrot.lane.b32.xlu1 %v2455_v11, %s2223_s25  ;;  %v2091_v11 = vld [vmem:[%s2725_s6 + $0x8] sm:$0xff]  }
0x2b39   :  { %2044 = vmatpush3.bf16.msra.mxu0 %v2091_v11 }
0x2b3c   :  { %906 = vrot.lane.b32.xlu1 %v2495_v6, %s2223_s25  ;;  %v1397_v6 = vpop.permute.xlu0 %1396 }
0x2b40   :  { %1102 = vrot.lane.b32.xlu1 %v2535_v1, %s2223_s25  ;;  %v1593_v29 = vpop.permute.xlu0 %1592 }
0x2b44   :  { %1298 = vrot.lane.b32.xlu1 %v2575_v58, %s2223_s25 }
0x2b48   :  { %1494 = vrot.lane.b32.xlu1 %v2615_v32, %s2223_s25  ;;  %v1841_v32 = vld [vmem:[%s2726_s7] ss:$0 sm:$0xff] }
0x2b9e   :  { %v1685_v1 = vpop.permute.xlu1 %1684 }
0x2b9f   :  { %v1687_v58 = vmul.f32 %v2217_v24, %v1685_v1 }
0x2ba1   :  { %1689 = vrot.lane.b32.xlu1 %v1687_v58, %s2223_s25 }
0x2ba2   :  { %v319_v36 = vpop.permute.xlu1 %318 }
0x2ba3   :  { %321 = vst.msk [vmem:[#allocation2 + $0x1] sm:$0x1] %vm221_vm3, %v319_v36 }
0x2ba4   :  { %322 = vst.msk [vmem:[#allocation2 + $0xe] sm:$0x1] %vm223_vm4, %v319_v36  ;;  %1596 = vst.msk [vmem:[#allocation2 + $0x1] sm:$0x1] %vm223_vm4, %v1593_v29 }
0x2ba5   :  { %1595 = vst.msk [vmem:[#allocation2 + $0xe] sm:$0x1] %vm221_vm3, %v1593_v29 }
0x2ba6   :  { %v515_v30 = vpop.permute.xlu1 %514 }
0x2ba7   :  { %517 = vst.msk [vmem:[#allocation2 + $0x3] sm:$0x1] %vm221_vm3, %v515_v30 }
0x2ba8   :  { %518 = vst.msk [vmem:[#allocation2 + $0xc] sm:$0x1] %vm223_vm4, %v515_v30  ;;  %1400 = vst.msk [vmem:[#allocation2 + $0x3] sm:$0x1] %vm223_vm4, %v1397_v6 }
0x2ba9   :  { %1399 = vst.msk [vmem:[#allocation2 + $0xc] sm:$0x1] %vm221_vm3, %v1397_v6 }
0x2baa   :  { %v711_v0 = vpop.permute.xlu1 %710 }
0x2bab   :  { %713 = vst.msk [vmem:[#allocation2 + $0x5] sm:$0x1] %vm221_vm3, %v711_v0 }
0x2bac   :  { %714 = vst.msk [vmem:[#allocation2 + $0xa] sm:$0x1] %vm223_vm4, %v711_v0  ;;  %1204 = vst.msk [vmem:[#allocation2 + $0x5] sm:$0x1] %vm223_vm4, %v1201_v16 }
0x2bad   :  { %1203 = vst.msk [vmem:[#allocation2 + $0xa] sm:$0x1] %vm221_vm3, %v1201_v16 }
0x2bae   :  { %v907_v31 = vpop.permute.xlu1 %906 }
0x2baf   :  { %909 = vst.msk [vmem:[#allocation2 + $0x7] sm:$0x1] %vm221_vm3, %v907_v31 }
0x2bb0   :  { %910 = vst.msk [vmem:[#allocation2 + $0x8] sm:$0x1] %vm223_vm4, %v907_v31  ;;  %1008 = vst.msk [vmem:[#allocation2 + $0x7] sm:$0x1] %vm223_vm4, %v1005_v27 }
0x2bb1   :  { %1007 = vst.msk [vmem:[#allocation2 + $0x8] sm:$0x1] %vm221_vm3, %v1005_v27 }
0x2bb2   :  { %v1103_v37 = vpop.permute.xlu1 %1102 }
0x2bb3   :  { %1105 = vst.msk [vmem:[#allocation2 + $0x9] sm:$0x1] %vm221_vm3, %v1103_v37 }
0x2bb4   :  { %1106 = vst.msk [vmem:[#allocation2 + $0x6] sm:$0x1] %vm223_vm4, %v1103_v37 }
0x2bb6   :  { %v1299_v34 = vpop.permute.xlu1 %1298 }
0x2bb7   :  { %1301 = vst.msk [vmem:[#allocation2 + $0xb] sm:$0x1] %vm221_vm3, %v1299_v34 }
0x2bb8   :  { %1302 = vst.msk [vmem:[#allocation2 + $0x4] sm:$0x1] %vm223_vm4, %v1299_v34 }
0x2bba   :  { %v1495_v44 = vpop.permute.xlu1 %1494 }
0x2bbb   :  { %1497 = vst.msk [vmem:[#allocation2 + $0xd] sm:$0x1] %vm221_vm3, %v1495_v44 }
0x2bbc   :  { %1498 = vst.msk [vmem:[#allocation2 + $0x2] sm:$0x1] %vm223_vm4, %v1495_v44 }
0x2c13   :  { %v1690_v48 = vpop.permute.xlu1 %1689 }
0x2c14   :  { %1692 = vst.msk [vmem:[#allocation2 + $0xf] sm:$0x1] %vm221_vm3, %v1690_v48 }
0x2c15   :  { %1693 = vst.msk [vmem:[#allocation2] sm:$0x1] %vm223_vm4, %v1690_v48 }
0x2c1b   :  { %v1695_v50 = vld [vmem:[#allocation2 + $0x8] sm:$0xff] }
0x2c1c   :  { %v1694_v49 = vld [vmem:[#allocation2] sm:$0xff] }
0x2c1d   :  { %v1696_v51 = vpack.c.bf16 %v1695_v50, %v1694_v49 }
0x2c1f   :  { %2046 = vmatmul.mubr.msk.bf16.vlgmr.msra.gmra.mrb[32].mxu0 %vm139_vm2, %v1696_v51 }
0x2cf2   :  { %v1757_v42 = vpop.f32.mrb[32].mxu0 }
0x2cf3   :  { %v1758_v53 = vadd.f32 %v1841_v32, %v1757_v42  ;;  %v2047_v54 = vpop.f32.mrb[33].mxu0 }
0x2cf4   :  { %v1760_v55 = vpop.f32.mrb[34].mxu0 }
0x2cf5   :  { %1764 = vst [vmem:[%s2727_s8] sm:$0xff] %v1758_v53  ;;  %v1761_v56 = vadd.f32 %v1841_v32, %v1760_v55  ;;  %v2048_v40 = vpop.f32.mrb[35].mxu0 }
0x2cf7   :  { %1765 = vst [vmem:[%s2727_s8 + $0x8] sm:$0xff] %v1761_v56 }

</bundles_post_ra>
